<compile_context>
chip_gen: v6e
topology: v6e:2x2x1
jax: 0.10.0
libtpu: 0.0.40
codegen_flags: <defaults>
</compile_context>

<pallas_src>
import numpy as np
import jax
import jax.numpy as jnp
from jax.experimental import pallas as pl
from jax.experimental.pallas import tpu as pltpu

WINDOW = 3
C1 = 0.01 ** 2
C2 = 0.03 ** 2


def _ssim_kernel(x_ref, y_ref, xh_ref, yh_ref, o_ref):
    """One (image n, row-tile t) grid step.

    x_ref, y_ref   : (C, tH, W)  unpadded body rows of this tile
    xh_ref, yh_ref : (C, 2, W)   halo rows [row above tile, row below tile]
                                 (image-border reflection already resolved by wrapper)
    o_ref          : (C, tH, W)
    """
    x = x_ref[...].astype(jnp.float32)
    y = y_ref[...].astype(jnp.float32)
    xh = xh_ref[...].astype(jnp.float32)
    yh = yh_ref[...].astype(jnp.float32)

    _, tH, W = x.shape
    inv_area = 1.0 / float(WINDOW * WINDOW)

    # Assemble the H-direction reflection pad in VMEM from body + 2 halo rows.
    xp = jnp.concatenate([xh[:, 0:1, :], x, xh[:, 1:2, :]], axis=1)  # (C, tH+2, W)
    yp = jnp.concatenate([yh[:, 0:1, :], y, yh[:, 1:2, :]], axis=1)

    # Hoisted loop-invariant lane masks for the W-reflect fixup (computed once, reused
    # by all 5 box-filter calls -- broadcast_in_dim is not CSE'd by JAX).
    lane = jax.lax.broadcasted_iota(jnp.int32, (x.shape[0], tH, W), 2)
    is_lo = lane == 0
    is_hi = lane == W - 1

    def box3(a):
        # Separable 3x3 box mean with reflect padding along W.
        # Row pass (sublane direction): (C, tH+2, W) -> (C, tH, W), 2 VPU adds.
        rs = a[:, 0:tH, :] + a[:, 1:tH + 1, :] + a[:, 2:tH + 2, :]
        # Column pass (lane direction): circular rolls on the XLU + reflect fixup.
        # The sum of the two neighbor rolls is symmetric in roll direction; shifts 1
        # and W-1 cover both neighbors.
        cs = pltpu.roll(rs, shift=1, axis=2) + rs + pltpu.roll(rs, shift=W - 1, axis=2)
        # Wrap-around lanes picked up rs[..., W-1] (at col 0) and rs[..., 0] (at col
        # W-1); reflection wants rs[..., 1] and rs[..., W-2] instead.
        fix_lo = rs[:, :, 1:2] - rs[:, :, W - 1:W]
        fix_hi = rs[:, :, W - 2:W - 1] - rs[:, :, 0:1]
        cs = cs + jnp.where(is_lo, fix_lo, 0.0) + jnp.where(is_hi, fix_hi, 0.0)
        return cs * inv_area

    mu_x = box3(xp)
    mu_y = box3(yp)
    sigma_x = box3(xp * xp) - mu_x * mu_x
    sigma_y = box3(yp * yp) - mu_y * mu_y
    sigma_xy = box3(xp * yp) - mu_x * mu_y

    ssim_n = (2.0 * mu_x * mu_y + C1) * (2.0 * sigma_xy + C2)
    ssim_d = (mu_x * mu_x + mu_y * mu_y + C1) * (sigma_x + sigma_y + C2)
    out = jnp.clip((1.0 - ssim_n / ssim_d) * 0.5, 0.0, 1.0)
    o_ref[...] = out.astype(o_ref.dtype)


def _pick_tile_rows(H, requested):
    """Largest multiple of 8 that divides H and is <= requested; else full H."""
    requested = max(1, min(int(requested), H))
    best = None
    for cand in range(8, H + 1, 8):
        if cand > requested:
            break
        if H % cand == 0:
            best = cand
    return best if best is not None else H


def ssim_pallas(x, y, *, tile_rows=None):
    """x, y: (N, C, H, W).  Returns clamp((1 - SSIM(x, y)) / 2, 0, 1), shape (N, C, H, W)."""
    assert x.shape == y.shape and x.ndim == 4
    N, C, H, W = x.shape
    assert H >= 2 and W >= 2, "ReflectionPad2d(1) needs spatial dims >= 2"

    if tile_rows is None:
        # Size the row tile so ~24 live f32 slabs of (C, tH+2, W) stay well under the
        # smallest per-generation VMEM budget (v7x: 64 MiB physical, 32 MiB scoped default).
        budget_bytes = 24 * 1024 * 1024
        tile_rows = max(8, budget_bytes // (24 * 4 * C * max(W, 1)))
    tH = _pick_tile_rows(H, tile_rows)
    T = H // tH

    # Tiny per-tile halo rows (2 rows per tile), extracted with a cheap row gather.
    # This replaces a full-image jnp.pad copy; extra HBM traffic is <= 2/tH of the input.
    top = np.arange(T) * tH - 1
    top[0] = 1                       # reflect: padded row -1 -> original row 1
    bot = (np.arange(T) + 1) * tH
    bot[-1] = H - 2                  # reflect: padded row H  -> original row H-2
    idx = np.stack([top, bot], axis=1)               # (T, 2)

    def halos(a):
        h = a[:, :, idx, :]                          # (N, C, T, 2, W)
        return jnp.transpose(h, (0, 2, 1, 3, 4))     # (N, T, C, 2, W)

    xh = halos(x)
    yh = halos(y)

    # TODO(synk): for small-W workloads (W << 128) a lane-dense repacking of the last
    # axis (folding C/batch into lanes) would avoid masked stores and padded-lane waste.

    body_spec = pl.BlockSpec((None, C, tH, W), lambda n, t: (n, 0, t, 0))
    halo_spec = pl.BlockSpec((None, None, C, 2, W), lambda n, t: (n, t, 0, 0, 0))
    out_spec = pl.BlockSpec((None, C, tH, W), lambda n, t: (n, 0, t, 0))

    tile_bytes = 4 * C * (tH + 2) * W
    vmem_limit = int(min(max(24 * tile_bytes, 32 * 1024 * 1024), 64 * 1024 * 1024))

    grid_spec = pltpu.PrefetchScalarGridSpec(
        num_scalar_prefetch=0,
        grid=(N, T),
        in_specs=[body_spec, body_spec, halo_spec, halo_spec],
        out_specs=out_spec,
    )

    return pl.pallas_call(
        _ssim_kernel,
        out_shape=jax.ShapeDtypeStruct((N, C, H, W), x.dtype),
        grid_spec=grid_spec,
        compiler_params=pltpu.CompilerParams(
            dimension_semantics=("parallel", "parallel"),
            vmem_limit_bytes=vmem_limit,
        ),
    )(x, y, xh, yh)


def ssim_reference(x, y):
    """Pure-JAX reference mirroring the PyTorch compute_simplified path."""
    pad = WINDOW // 2
    xp = jnp.pad(x, ((0, 0), (0, 0), (pad, pad), (pad, pad)), mode="reflect")
    yp = jnp.pad(y, ((0, 0), (0, 0), (pad, pad), (pad, pad)), mode="reflect")

    def avg_pool(a):
        return jax.lax.reduce_window(
            a, 0.0, jax.lax.add,
            window_dimensions=(1, 1, WINDOW, WINDOW),
            window_strides=(1, 1, 1, 1),
            padding="VALID",
        ) / float(WINDOW * WINDOW)

    mu_x = avg_pool(xp)
    mu_y = avg_pool(yp)
    sigma_x = avg_pool(xp * xp) - mu_x ** 2
    sigma_y = avg_pool(yp * yp) - mu_y ** 2
    sigma_xy = avg_pool(xp * yp) - mu_x * mu_y
    n = (2 * mu_x * mu_y + C1) * (2 * sigma_xy + C2)
    d = (mu_x ** 2 + mu_y ** 2 + C1) * (sigma_x + sigma_y + C2)
    return jnp.clip((1 - n / d) / 2, 0.0, 1.0)


if __name__ == "__main__":
    key = jax.random.PRNGKey(0)
    kx, ky = jax.random.split(key)
    N, C, H, W = 2, 4, 16, 16
    x = jax.random.uniform(kx, (N, C, H, W), dtype=jnp.float32)
    y = jax.random.uniform(ky, (N, C, H, W), dtype=jnp.float32)

    # tile_rows=8 forces two row-tiles per image so the halo / tiling path is exercised.
    out = ssim_pallas(x, y, tile_rows=8)
    jax.block_until_ready(out)

    ref = ssim_reference(x, y)
    assert out.shape == (N, C, H, W)
    assert jnp.allclose(out, ref, atol=1e-5, rtol=1e-5), "mismatch vs reference"

    # Also exercise the single-tile (T == 1) path.
    out1 = ssim_pallas(x, y)
    jax.block_until_ready(out1)
    assert jnp.allclose(out1, ref, atol=1e-5, rtol=1e-5), "mismatch vs reference (T=1)"

    print("KERNEL_OK")
</pallas_src>

<mosaic_0001>
module attributes {stable_mosaic.version = 11 : i64} {
  func.func @_ssim_kernel(%arg0: i32, %arg1: i32, %arg2: memref<1x4x8x16xf32, #tpu.memory_space<vmem>>, %arg3: memref<1x4x8x16xf32, #tpu.memory_space<vmem>>, %arg4: memref<1x1x4x2x16xf32, #tpu.memory_space<vmem>>, %arg5: memref<1x1x4x2x16xf32, #tpu.memory_space<vmem>>, %arg6: memref<1x4x8x16xf32, #tpu.memory_space<vmem>>) attributes {dimension_semantics = [#tpu.dimension_semantics<parallel>, #tpu.dimension_semantics<parallel>], iteration_bounds = array<i64: 2, 2>, scalar_prefetch = 0 : i64, scratch_operands = 0 : i64, tpu.core_type = #tpu.core_type<tc>, window_params = [{transform_indices = @transform_0, window_bounds = array<i64: 1, 4, 8, 16>}, {transform_indices = @transform_1, window_bounds = array<i64: 1, 4, 8, 16>}, {transform_indices = @transform_2, window_bounds = array<i64: 1, 1, 4, 2, 16>}, {transform_indices = @transform_3, window_bounds = array<i64: 1, 1, 4, 2, 16>}, {transform_indices = @transform_4, window_bounds = array<i64: 1, 4, 8, 16>}]} {
    %c0 = arith.constant 0 : index
    %c0_0 = arith.constant 0 : index
    %c0_1 = arith.constant 0 : index
    %c0_2 = arith.constant 0 : index
    %0 = vector.load %arg2[%c0, %c0_0, %c0_1, %c0_2] : memref<1x4x8x16xf32, #tpu.memory_space<vmem>>, vector<1x4x8x16xf32>
    %1 = vector.shape_cast %0 : vector<1x4x8x16xf32> to vector<4x8x16xf32>
    %c0_3 = arith.constant 0 : index
    %c0_4 = arith.constant 0 : index
    %c0_5 = arith.constant 0 : index
    %c0_6 = arith.constant 0 : index
    %2 = vector.load %arg3[%c0_3, %c0_4, %c0_5, %c0_6] : memref<1x4x8x16xf32, #tpu.memory_space<vmem>>, vector<1x4x8x16xf32>
    %3 = vector.shape_cast %2 : vector<1x4x8x16xf32> to vector<4x8x16xf32>
    %c0_7 = arith.constant 0 : index
    %c0_8 = arith.constant 0 : index
    %c0_9 = arith.constant 0 : index
    %c0_10 = arith.constant 0 : index
    %c0_11 = arith.constant 0 : index
    %4 = vector.load %arg4[%c0_7, %c0_8, %c0_9, %c0_10, %c0_11] : memref<1x1x4x2x16xf32, #tpu.memory_space<vmem>>, vector<1x1x4x2x16xf32>
    %5 = vector.shape_cast %4 : vector<1x1x4x2x16xf32> to vector<4x2x16xf32>
    %c0_12 = arith.constant 0 : index
    %c0_13 = arith.constant 0 : index
    %c0_14 = arith.constant 0 : index
    %c0_15 = arith.constant 0 : index
    %c0_16 = arith.constant 0 : index
    %6 = vector.load %arg5[%c0_12, %c0_13, %c0_14, %c0_15, %c0_16] : memref<1x1x4x2x16xf32, #tpu.memory_space<vmem>>, vector<1x1x4x2x16xf32>
    %7 = vector.shape_cast %6 : vector<1x1x4x2x16xf32> to vector<4x2x16xf32>
    %8 = vector.extract_strided_slice %5 {offsets = [0, 0, 0], sizes = [4, 1, 16], strides = [1, 1, 1]} : vector<4x2x16xf32> to vector<4x1x16xf32>
    %9 = vector.extract_strided_slice %5 {offsets = [0, 1, 0], sizes = [4, 1, 16], strides = [1, 1, 1]} : vector<4x2x16xf32> to vector<4x1x16xf32>
    %10 = tpu.concatenate %8, %1, %9 in 1 : vector<4x1x16xf32>, vector<4x8x16xf32>, vector<4x1x16xf32> -> vector<4x10x16xf32>
    %11 = vector.extract_strided_slice %7 {offsets = [0, 0, 0], sizes = [4, 1, 16], strides = [1, 1, 1]} : vector<4x2x16xf32> to vector<4x1x16xf32>
    %12 = vector.extract_strided_slice %7 {offsets = [0, 1, 0], sizes = [4, 1, 16], strides = [1, 1, 1]} : vector<4x2x16xf32> to vector<4x1x16xf32>
    %13 = tpu.concatenate %11, %3, %12 in 1 : vector<4x1x16xf32>, vector<4x8x16xf32>, vector<4x1x16xf32> -> vector<4x10x16xf32>
    %14 = tpu.iota {dimensions = array<i32: 2>} : vector<4x8x16xi32>
    %c0_i32 = arith.constant 0 : i32
    %15 = vector.broadcast %c0_i32 : i32 to vector<4x8x16xi32>
    %16 = arith.cmpi eq, %14, %15 : vector<4x8x16xi32>
    %c15_i32 = arith.constant 15 : i32
    %17 = vector.broadcast %c15_i32 : i32 to vector<4x8x16xi32>
    %18 = arith.cmpi eq, %14, %17 : vector<4x8x16xi32>
    %19 = vector.extract_strided_slice %10 {offsets = [0, 0, 0], sizes = [4, 8, 16], strides = [1, 1, 1]} : vector<4x10x16xf32> to vector<4x8x16xf32>
    %20 = vector.extract_strided_slice %10 {offsets = [0, 1, 0], sizes = [4, 8, 16], strides = [1, 1, 1]} : vector<4x10x16xf32> to vector<4x8x16xf32>
    %21 = arith.addf %19, %20 : vector<4x8x16xf32>
    %22 = vector.extract_strided_slice %10 {offsets = [0, 2, 0], sizes = [4, 8, 16], strides = [1, 1, 1]} : vector<4x10x16xf32> to vector<4x8x16xf32>
    %23 = arith.addf %21, %22 : vector<4x8x16xf32>
    %c1_i32 = arith.constant 1 : i32
    %24 = tpu.dynamic_rotate %23 by %c1_i32 dim 2 : vector<4x8x16xf32>, i32 -> vector<4x8x16xf32>
    %25 = arith.addf %24, %23 : vector<4x8x16xf32>
    %c15_i32_17 = arith.constant 15 : i32
    %26 = tpu.dynamic_rotate %23 by %c15_i32_17 dim 2 : vector<4x8x16xf32>, i32 -> vector<4x8x16xf32>
    %27 = arith.addf %25, %26 : vector<4x8x16xf32>
    %28 = vector.extract_strided_slice %23 {offsets = [0, 0, 1], sizes = [4, 8, 1], strides = [1, 1, 1]} : vector<4x8x16xf32> to vector<4x8x1xf32>
    %29 = vector.extract_strided_slice %23 {offsets = [0, 0, 15], sizes = [4, 8, 1], strides = [1, 1, 1]} : vector<4x8x16xf32> to vector<4x8x1xf32>
    %30 = arith.subf %28, %29 : vector<4x8x1xf32>
    %31 = vector.extract_strided_slice %23 {offsets = [0, 0, 14], sizes = [4, 8, 1], strides = [1, 1, 1]} : vector<4x8x16xf32> to vector<4x8x1xf32>
    %32 = vector.extract_strided_slice %23 {offsets = [0, 0, 0], sizes = [4, 8, 1], strides = [1, 1, 1]} : vector<4x8x16xf32> to vector<4x8x1xf32>
    %33 = arith.subf %31, %32 : vector<4x8x1xf32>
    %cst = arith.constant 0.000000e+00 : f32
    %34 = vector.shape_cast %30 : vector<4x8x1xf32> to vector<4x8x1xf32>
    %35 = vector.broadcast %34 : vector<4x8x1xf32> to vector<4x8x16xf32>
    %36 = vector.broadcast %cst : f32 to vector<4x8x16xf32>
    %37 = arith.select %16, %35, %36 : vector<4x8x16xi1>, vector<4x8x16xf32>
    %38 = arith.addf %27, %37 : vector<4x8x16xf32>
    %cst_18 = arith.constant 0.000000e+00 : f32
    %39 = vector.shape_cast %33 : vector<4x8x1xf32> to vector<4x8x1xf32>
    %40 = vector.broadcast %39 : vector<4x8x1xf32> to vector<4x8x16xf32>
    %41 = vector.broadcast %cst_18 : f32 to vector<4x8x16xf32>
    %42 = arith.select %18, %40, %41 : vector<4x8x16xi1>, vector<4x8x16xf32>
    %43 = arith.addf %38, %42 : vector<4x8x16xf32>
    %cst_19 = arith.constant 0.111111112 : f32
    %44 = vector.broadcast %cst_19 : f32 to vector<4x8x16xf32>
    %45 = arith.mulf %43, %44 : vector<4x8x16xf32>
    %46 = vector.extract_strided_slice %13 {offsets = [0, 0, 0], sizes = [4, 8, 16], strides = [1, 1, 1]} : vector<4x10x16xf32> to vector<4x8x16xf32>
    %47 = vector.extract_strided_slice %13 {offsets = [0, 1, 0], sizes = [4, 8, 16], strides = [1, 1, 1]} : vector<4x10x16xf32> to vector<4x8x16xf32>
    %48 = arith.addf %46, %47 : vector<4x8x16xf32>
    %49 = vector.extract_strided_slice %13 {offsets = [0, 2, 0], sizes = [4, 8, 16], strides = [1, 1, 1]} : vector<4x10x16xf32> to vector<4x8x16xf32>
    %50 = arith.addf %48, %49 : vector<4x8x16xf32>
    %c1_i32_20 = arith.constant 1 : i32
    %51 = tpu.dynamic_rotate %50 by %c1_i32_20 dim 2 : vector<4x8x16xf32>, i32 -> vector<4x8x16xf32>
    %52 = arith.addf %51, %50 : vector<4x8x16xf32>
    %c15_i32_21 = arith.constant 15 : i32
    %53 = tpu.dynamic_rotate %50 by %c15_i32_21 dim 2 : vector<4x8x16xf32>, i32 -> vector<4x8x16xf32>
    %54 = arith.addf %52, %53 : vector<4x8x16xf32>
    %55 = vector.extract_strided_slice %50 {offsets = [0, 0, 1], sizes = [4, 8, 1], strides = [1, 1, 1]} : vector<4x8x16xf32> to vector<4x8x1xf32>
    %56 = vector.extract_strided_slice %50 {offsets = [0, 0, 15], sizes = [4, 8, 1], strides = [1, 1, 1]} : vector<4x8x16xf32> to vector<4x8x1xf32>
    %57 = arith.subf %55, %56 : vector<4x8x1xf32>
    %58 = vector.extract_strided_slice %50 {offsets = [0, 0, 14], sizes = [4, 8, 1], strides = [1, 1, 1]} : vector<4x8x16xf32> to vector<4x8x1xf32>
    %59 = vector.extract_strided_slice %50 {offsets = [0, 0, 0], sizes = [4, 8, 1], strides = [1, 1, 1]} : vector<4x8x16xf32> to vector<4x8x1xf32>
    %60 = arith.subf %58, %59 : vector<4x8x1xf32>
    %cst_22 = arith.constant 0.000000e+00 : f32
    %61 = vector.shape_cast %57 : vector<4x8x1xf32> to vector<4x8x1xf32>
    %62 = vector.broadcast %61 : vector<4x8x1xf32> to vector<4x8x16xf32>
    %63 = vector.broadcast %cst_22 : f32 to vector<4x8x16xf32>
    %64 = arith.select %16, %62, %63 : vector<4x8x16xi1>, vector<4x8x16xf32>
    %65 = arith.addf %54, %64 : vector<4x8x16xf32>
    %cst_23 = arith.constant 0.000000e+00 : f32
    %66 = vector.shape_cast %60 : vector<4x8x1xf32> to vector<4x8x1xf32>
    %67 = vector.broadcast %66 : vector<4x8x1xf32> to vector<4x8x16xf32>
    %68 = vector.broadcast %cst_23 : f32 to vector<4x8x16xf32>
    %69 = arith.select %18, %67, %68 : vector<4x8x16xi1>, vector<4x8x16xf32>
    %70 = arith.addf %65, %69 : vector<4x8x16xf32>
    %cst_24 = arith.constant 0.111111112 : f32
    %71 = vector.broadcast %cst_24 : f32 to vector<4x8x16xf32>
    %72 = arith.mulf %70, %71 : vector<4x8x16xf32>
    %73 = arith.mulf %10, %10 : vector<4x10x16xf32>
    %74 = vector.extract_strided_slice %73 {offsets = [0, 0, 0], sizes = [4, 8, 16], strides = [1, 1, 1]} : vector<4x10x16xf32> to vector<4x8x16xf32>
    %75 = vector.extract_strided_slice %73 {offsets = [0, 1, 0], sizes = [4, 8, 16], strides = [1, 1, 1]} : vector<4x10x16xf32> to vector<4x8x16xf32>
    %76 = arith.addf %74, %75 : vector<4x8x16xf32>
    %77 = vector.extract_strided_slice %73 {offsets = [0, 2, 0], sizes = [4, 8, 16], strides = [1, 1, 1]} : vector<4x10x16xf32> to vector<4x8x16xf32>
    %78 = arith.addf %76, %77 : vector<4x8x16xf32>
    %c1_i32_25 = arith.constant 1 : i32
    %79 = tpu.dynamic_rotate %78 by %c1_i32_25 dim 2 : vector<4x8x16xf32>, i32 -> vector<4x8x16xf32>
    %80 = arith.addf %79, %78 : vector<4x8x16xf32>
    %c15_i32_26 = arith.constant 15 : i32
    %81 = tpu.dynamic_rotate %78 by %c15_i32_26 dim 2 : vector<4x8x16xf32>, i32 -> vector<4x8x16xf32>
    %82 = arith.addf %80, %81 : vector<4x8x16xf32>
    %83 = vector.extract_strided_slice %78 {offsets = [0, 0, 1], sizes = [4, 8, 1], strides = [1, 1, 1]} : vector<4x8x16xf32> to vector<4x8x1xf32>
    %84 = vector.extract_strided_slice %78 {offsets = [0, 0, 15], sizes = [4, 8, 1], strides = [1, 1, 1]} : vector<4x8x16xf32> to vector<4x8x1xf32>
    %85 = arith.subf %83, %84 : vector<4x8x1xf32>
    %86 = vector.extract_strided_slice %78 {offsets = [0, 0, 14], sizes = [4, 8, 1], strides = [1, 1, 1]} : vector<4x8x16xf32> to vector<4x8x1xf32>
    %87 = vector.extract_strided_slice %78 {offsets = [0, 0, 0], sizes = [4, 8, 1], strides = [1, 1, 1]} : vector<4x8x16xf32> to vector<4x8x1xf32>
    %88 = arith.subf %86, %87 : vector<4x8x1xf32>
    %cst_27 = arith.constant 0.000000e+00 : f32
    %89 = vector.shape_cast %85 : vector<4x8x1xf32> to vector<4x8x1xf32>
    %90 = vector.broadcast %89 : vector<4x8x1xf32> to vector<4x8x16xf32>
    %91 = vector.broadcast %cst_27 : f32 to vector<4x8x16xf32>
    %92 = arith.select %16, %90, %91 : vector<4x8x16xi1>, vector<4x8x16xf32>
    %93 = arith.addf %82, %92 : vector<4x8x16xf32>
    %cst_28 = arith.constant 0.000000e+00 : f32
    %94 = vector.shape_cast %88 : vector<4x8x1xf32> to vector<4x8x1xf32>
    %95 = vector.broadcast %94 : vector<4x8x1xf32> to vector<4x8x16xf32>
    %96 = vector.broadcast %cst_28 : f32 to vector<4x8x16xf32>
    %97 = arith.select %18, %95, %96 : vector<4x8x16xi1>, vector<4x8x16xf32>
    %98 = arith.addf %93, %97 : vector<4x8x16xf32>
    %cst_29 = arith.constant 0.111111112 : f32
    %99 = vector.broadcast %cst_29 : f32 to vector<4x8x16xf32>
    %100 = arith.mulf %98, %99 : vector<4x8x16xf32>
    %101 = arith.mulf %45, %45 : vector<4x8x16xf32>
    %102 = arith.subf %100, %101 : vector<4x8x16xf32>
    %103 = arith.mulf %13, %13 : vector<4x10x16xf32>
    %104 = vector.extract_strided_slice %103 {offsets = [0, 0, 0], sizes = [4, 8, 16], strides = [1, 1, 1]} : vector<4x10x16xf32> to vector<4x8x16xf32>
    %105 = vector.extract_strided_slice %103 {offsets = [0, 1, 0], sizes = [4, 8, 16], strides = [1, 1, 1]} : vector<4x10x16xf32> to vector<4x8x16xf32>
    %106 = arith.addf %104, %105 : vector<4x8x16xf32>
    %107 = vector.extract_strided_slice %103 {offsets = [0, 2, 0], sizes = [4, 8, 16], strides = [1, 1, 1]} : vector<4x10x16xf32> to vector<4x8x16xf32>
    %108 = arith.addf %106, %107 : vector<4x8x16xf32>
    %c1_i32_30 = arith.constant 1 : i32
    %109 = tpu.dynamic_rotate %108 by %c1_i32_30 dim 2 : vector<4x8x16xf32>, i32 -> vector<4x8x16xf32>
    %110 = arith.addf %109, %108 : vector<4x8x16xf32>
    %c15_i32_31 = arith.constant 15 : i32
    %111 = tpu.dynamic_rotate %108 by %c15_i32_31 dim 2 : vector<4x8x16xf32>, i32 -> vector<4x8x16xf32>
    %112 = arith.addf %110, %111 : vector<4x8x16xf32>
    %113 = vector.extract_strided_slice %108 {offsets = [0, 0, 1], sizes = [4, 8, 1], strides = [1, 1, 1]} : vector<4x8x16xf32> to vector<4x8x1xf32>
    %114 = vector.extract_strided_slice %108 {offsets = [0, 0, 15], sizes = [4, 8, 1], strides = [1, 1, 1]} : vector<4x8x16xf32> to vector<4x8x1xf32>
    %115 = arith.subf %113, %114 : vector<4x8x1xf32>
    %116 = vector.extract_strided_slice %108 {offsets = [0, 0, 14], sizes = [4, 8, 1], strides = [1, 1, 1]} : vector<4x8x16xf32> to vector<4x8x1xf32>
    %117 = vector.extract_strided_slice %108 {offsets = [0, 0, 0], sizes = [4, 8, 1], strides = [1, 1, 1]} : vector<4x8x16xf32> to vector<4x8x1xf32>
    %118 = arith.subf %116, %117 : vector<4x8x1xf32>
    %cst_32 = arith.constant 0.000000e+00 : f32
    %119 = vector.shape_cast %115 : vector<4x8x1xf32> to vector<4x8x1xf32>
    %120 = vector.broadcast %119 : vector<4x8x1xf32> to vector<4x8x16xf32>
    %121 = vector.broadcast %cst_32 : f32 to vector<4x8x16xf32>
    %122 = arith.select %16, %120, %121 : vector<4x8x16xi1>, vector<4x8x16xf32>
    %123 = arith.addf %112, %122 : vector<4x8x16xf32>
    %cst_33 = arith.constant 0.000000e+00 : f32
    %124 = vector.shape_cast %118 : vector<4x8x1xf32> to vector<4x8x1xf32>
    %125 = vector.broadcast %124 : vector<4x8x1xf32> to vector<4x8x16xf32>
    %126 = vector.broadcast %cst_33 : f32 to vector<4x8x16xf32>
    %127 = arith.select %18, %125, %126 : vector<4x8x16xi1>, vector<4x8x16xf32>
    %128 = arith.addf %123, %127 : vector<4x8x16xf32>
    %cst_34 = arith.constant 0.111111112 : f32
    %129 = vector.broadcast %cst_34 : f32 to vector<4x8x16xf32>
    %130 = arith.mulf %128, %129 : vector<4x8x16xf32>
    %131 = arith.mulf %72, %72 : vector<4x8x16xf32>
    %132 = arith.subf %130, %131 : vector<4x8x16xf32>
    %133 = arith.mulf %10, %13 : vector<4x10x16xf32>
    %134 = vector.extract_strided_slice %133 {offsets = [0, 0, 0], sizes = [4, 8, 16], strides = [1, 1, 1]} : vector<4x10x16xf32> to vector<4x8x16xf32>
    %135 = vector.extract_strided_slice %133 {offsets = [0, 1, 0], sizes = [4, 8, 16], strides = [1, 1, 1]} : vector<4x10x16xf32> to vector<4x8x16xf32>
    %136 = arith.addf %134, %135 : vector<4x8x16xf32>
    %137 = vector.extract_strided_slice %133 {offsets = [0, 2, 0], sizes = [4, 8, 16], strides = [1, 1, 1]} : vector<4x10x16xf32> to vector<4x8x16xf32>
    %138 = arith.addf %136, %137 : vector<4x8x16xf32>
    %c1_i32_35 = arith.constant 1 : i32
    %139 = tpu.dynamic_rotate %138 by %c1_i32_35 dim 2 : vector<4x8x16xf32>, i32 -> vector<4x8x16xf32>
    %140 = arith.addf %139, %138 : vector<4x8x16xf32>
    %c15_i32_36 = arith.constant 15 : i32
    %141 = tpu.dynamic_rotate %138 by %c15_i32_36 dim 2 : vector<4x8x16xf32>, i32 -> vector<4x8x16xf32>
    %142 = arith.addf %140, %141 : vector<4x8x16xf32>
    %143 = vector.extract_strided_slice %138 {offsets = [0, 0, 1], sizes = [4, 8, 1], strides = [1, 1, 1]} : vector<4x8x16xf32> to vector<4x8x1xf32>
    %144 = vector.extract_strided_slice %138 {offsets = [0, 0, 15], sizes = [4, 8, 1], strides = [1, 1, 1]} : vector<4x8x16xf32> to vector<4x8x1xf32>
    %145 = arith.subf %143, %144 : vector<4x8x1xf32>
    %146 = vector.extract_strided_slice %138 {offsets = [0, 0, 14], sizes = [4, 8, 1], strides = [1, 1, 1]} : vector<4x8x16xf32> to vector<4x8x1xf32>
    %147 = vector.extract_strided_slice %138 {offsets = [0, 0, 0], sizes = [4, 8, 1], strides = [1, 1, 1]} : vector<4x8x16xf32> to vector<4x8x1xf32>
    %148 = arith.subf %146, %147 : vector<4x8x1xf32>
    %cst_37 = arith.constant 0.000000e+00 : f32
    %149 = vector.shape_cast %145 : vector<4x8x1xf32> to vector<4x8x1xf32>
    %150 = vector.broadcast %149 : vector<4x8x1xf32> to vector<4x8x16xf32>
    %151 = vector.broadcast %cst_37 : f32 to vector<4x8x16xf32>
    %152 = arith.select %16, %150, %151 : vector<4x8x16xi1>, vector<4x8x16xf32>
    %153 = arith.addf %142, %152 : vector<4x8x16xf32>
    %cst_38 = arith.constant 0.000000e+00 : f32
    %154 = vector.shape_cast %148 : vector<4x8x1xf32> to vector<4x8x1xf32>
    %155 = vector.broadcast %154 : vector<4x8x1xf32> to vector<4x8x16xf32>
    %156 = vector.broadcast %cst_38 : f32 to vector<4x8x16xf32>
    %157 = arith.select %18, %155, %156 : vector<4x8x16xi1>, vector<4x8x16xf32>
    %158 = arith.addf %153, %157 : vector<4x8x16xf32>
    %cst_39 = arith.constant 0.111111112 : f32
    %159 = vector.broadcast %cst_39 : f32 to vector<4x8x16xf32>
    %160 = arith.mulf %158, %159 : vector<4x8x16xf32>
    %161 = arith.mulf %45, %72 : vector<4x8x16xf32>
    %162 = arith.subf %160, %161 : vector<4x8x16xf32>
    %cst_40 = arith.constant 2.000000e+00 : f32
    %163 = vector.broadcast %cst_40 : f32 to vector<4x8x16xf32>
    %164 = arith.mulf %163, %45 : vector<4x8x16xf32>
    %165 = arith.mulf %164, %72 : vector<4x8x16xf32>
    %cst_41 = arith.constant 9.99999974E-5 : f32
    %166 = vector.broadcast %cst_41 : f32 to vector<4x8x16xf32>
    %167 = arith.addf %165, %166 : vector<4x8x16xf32>
    %cst_42 = arith.constant 2.000000e+00 : f32
    %168 = vector.broadcast %cst_42 : f32 to vector<4x8x16xf32>
    %169 = arith.mulf %168, %162 : vector<4x8x16xf32>
    %cst_43 = arith.constant 8.99999984E-4 : f32
    %170 = vector.broadcast %cst_43 : f32 to vector<4x8x16xf32>
    %171 = arith.addf %169, %170 : vector<4x8x16xf32>
    %172 = arith.mulf %167, %171 : vector<4x8x16xf32>
    %173 = arith.mulf %45, %45 : vector<4x8x16xf32>
    %174 = arith.mulf %72, %72 : vector<4x8x16xf32>
    %175 = arith.addf %173, %174 : vector<4x8x16xf32>
    %cst_44 = arith.constant 9.99999974E-5 : f32
    %176 = vector.broadcast %cst_44 : f32 to vector<4x8x16xf32>
    %177 = arith.addf %175, %176 : vector<4x8x16xf32>
    %178 = arith.addf %102, %132 : vector<4x8x16xf32>
    %cst_45 = arith.constant 8.99999984E-4 : f32
    %179 = vector.broadcast %cst_45 : f32 to vector<4x8x16xf32>
    %180 = arith.addf %178, %179 : vector<4x8x16xf32>
    %181 = arith.mulf %177, %180 : vector<4x8x16xf32>
    %182 = arith.divf %172, %181 : vector<4x8x16xf32>
    %cst_46 = arith.constant 1.000000e+00 : f32
    %183 = vector.broadcast %cst_46 : f32 to vector<4x8x16xf32>
    %184 = arith.subf %183, %182 : vector<4x8x16xf32>
    %cst_47 = arith.constant 5.000000e-01 : f32
    %185 = vector.broadcast %cst_47 : f32 to vector<4x8x16xf32>
    %186 = arith.mulf %184, %185 : vector<4x8x16xf32>
    %cst_48 = arith.constant 0.000000e+00 : f32
    %cst_49 = arith.constant 1.000000e+00 : f32
    %187 = vector.broadcast %cst_48 : f32 to vector<4x8x16xf32>
    %188 = arith.maximumf %187, %186 : vector<4x8x16xf32>
    %189 = vector.broadcast %cst_49 : f32 to vector<4x8x16xf32>
    %190 = arith.minimumf %189, %188 : vector<4x8x16xf32>
    %c0_50 = arith.constant 0 : index
    %c0_51 = arith.constant 0 : index
    %c0_52 = arith.constant 0 : index
    %c0_53 = arith.constant 0 : index
    %191 = vector.load %arg6[%c0_50, %c0_51, %c0_52, %c0_53] : memref<1x4x8x16xf32, #tpu.memory_space<vmem>>, vector<1x4x8x16xf32>
    %192 = vector.shape_cast %191 : vector<1x4x8x16xf32> to vector<4x8x16xf32>
    %193 = vector.shape_cast %190 : vector<4x8x16xf32> to vector<1x4x8x16xf32>
    tpu.vector_store %arg6[%c0_50, %c0_51, %c0_52, %c0_53], %193 {strides = array<i32>} : memref<1x4x8x16xf32, #tpu.memory_space<vmem>>, vector<1x4x8x16xf32>,
    return
  }
  func.func @transform_0(%arg0: i32, %arg1: i32) -> (i32, i32, i32, i32) {
    %c0_i32 = arith.constant 0 : i32
    %c0_i32_0 = arith.constant 0 : i32
    %c0_i32_1 = arith.constant 0 : i32
    return %arg0, %c0_i32, %arg1, %c0_i32_0 : i32, i32, i32, i32
  }
  func.func @transform_1(%arg0: i32, %arg1: i32) -> (i32, i32, i32, i32) {
    %c0_i32 = arith.constant 0 : i32
    %c0_i32_0 = arith.constant 0 : i32
    %c0_i32_1 = arith.constant 0 : i32
    return %arg0, %c0_i32, %arg1, %c0_i32_0 : i32, i32, i32, i32
  }
  func.func @transform_2(%arg0: i32, %arg1: i32) -> (i32, i32, i32, i32, i32) {
    %c0_i32 = arith.constant 0 : i32
    %c0_i32_0 = arith.constant 0 : i32
    %c0_i32_1 = arith.constant 0 : i32
    %c0_i32_2 = arith.constant 0 : i32
    return %arg0, %arg1, %c0_i32, %c0_i32_0, %c0_i32_1 : i32, i32, i32, i32, i32
  }
  func.func @transform_3(%arg0: i32, %arg1: i32) -> (i32, i32, i32, i32, i32) {
    %c0_i32 = arith.constant 0 : i32
    %c0_i32_0 = arith.constant 0 : i32
    %c0_i32_1 = arith.constant 0 : i32
    %c0_i32_2 = arith.constant 0 : i32
    return %arg0, %arg1, %c0_i32, %c0_i32_0, %c0_i32_1 : i32, i32, i32, i32, i32
  }
  func.func @transform_4(%arg0: i32, %arg1: i32) -> (i32, i32, i32, i32) {
    %c0_i32 = arith.constant 0 : i32
    %c0_i32_0 = arith.constant 0 : i32
    %c0_i32_1 = arith.constant 0 : i32
    return %arg0, %c0_i32, %arg1, %c0_i32_0 : i32, i32, i32, i32
  }
}

</mosaic_0001>

<bundles_post_ra>
// kernel: tpu_custom_call.1
= control target key start
LH: loop header
LB: loop body
LE: loop exit
PB: predicated region body
PF: predicated region fallthrough
CT: control target
= control target key end

     0   :  { %s3535_s0 = inlined_call_operand.hbm [shape: f32[2,4,16,16], index: 0, kind: input, shape index: {}]   ;;  %s3536_s1 = inlined_call_operand.hbm [shape: f32[2,4,16,16], index: 1, kind: input, shape index: {}]   ;;  %s3537_s2 = inlined_call_operand.hbm [shape: f32[2,2,4,2,16], index: 2, kind: input, shape index: {}]   ;;  %s3538_s3 = inlined_call_operand.hbm [shape: f32[2,2,4,2,16], index: 3, kind: input, shape index: {}]   ;;  %s3539_s4 = inlined_call_operand.hbm [shape: f32[2,4,16,16], index: 4, kind: output, shape index: {}]  }
   0x1   :  { %3554 = sst [smem:[#allocation25_spill]] %s3535_s0 }
   0x2   :  { %3555 = sst [smem:[#allocation26_spill]] %s3536_s1 }
   0x3   :  { %3556 = sst [smem:[#allocation27_spill]] %s3539_s4 }
   0x4   :  { %9 = vsyncpa [#allocation3], 0 }
   0x5   :  { %11 = vsyncpa [#allocation3 + $0x1], 0 }
   0x6   :  { %12 = vsyncpa [#allocation6], 0 }
   0x7   :  { %14 = vsyncpa [#allocation6 + $0x1], 0 }
   0x8   :  { %15 = vsyncpa [#allocation9], 0 }
   0x9   :  { %17 = vsyncpa [#allocation9 + $0x1], 0 }
   0xa   :  { %18 = vsyncpa [#allocation4], 0 }
   0xb   :  { %20 = vsyncpa [#allocation4 + $0x1], 0  ;;  %s2341_s15 = smov 0   ;;  %s2343_s16 = smov 0  }
   0xc   :  { %s2345_s17 = smov 0   ;;  %s2347_s18 = smov 0  }
   0xd   :  { %s2349_s19 = smov 0   ;;  %s2351_s20 = smov 0  }
   0xe   :  { %s2353_s21 = smov 0   ;;  %s2355_s22 = smov 0  }
   0xf LB: > { %3557 = sst [smem:[#allocation15_spill]] %s2266_s15  ;;  %s2382_s23 = sadd.s32 4294967295, %s2294_s22   ;;  %s2294_s22 = sphi %s2355_s22, %s26_s22   ;;  %s2290_s21 = sphi %s2353_s21, %s3596_s21   ;;  %s2286_s20 = sphi %s2351_s20, %s3595_s20   ;;  %s2282_s19 = sphi %s2349_s19, %s3594_s19   ;;  %s2278_s18 = sphi %s2347_s18, %s3593_s18   ;;  %s2274_s17 = sphi %s2345_s17, %s3588_s17   ;;  %s2270_s16 = sphi %s2343_s16, %s3592_s16   ;;  %s2266_s15 = sphi %s2341_s15, %s3591_s15  }
  0x10   : > { %3558 = sst [smem:[#allocation16_spill]] %s2274_s17  ;;  %s1920_s24 = sadd.s32 4294967294, %s2294_s22  }
  0x11   : > { %3559 = sst [smem:[#allocation17_spill]] %s2294_s22  ;;  %s35_s25 = sadd.s32 1, %s2286_s20 }
  0x12   : > { %s38_s26 = sadd.s32 1, %s2290_s21  ;;  %p36_p0 = scmp.ge.s32.totalorder %s35_s25, 2 }
  0x13   : > { %s47_s27 = sadd.s32 1, %s2274_s17  ;;  %p54_p1 = scmp.ne.s32.totalorder %s2274_s17, %s2270_s16 }
  0x14   : > { %p55_p2 = scmp.eq.s32.totalorder %s2294_s22, 0  ;;  %s3598_s25 = smov (%p36_p0, %s35_s25), 0 }
  0x15   : > { %3560 = sst [smem:[#allocation18_spill]] %s3598_s25  ;;  %s3600_s26 = smov (!%p36_p0, %s38_s26), %s2290_s21 }
  0x16   : > { %s43_s28 = ssub.s32 %s2286_s20, %s3598_s25  ;;  %p2396_p3 = por %p55_p2, %p54_p1 }
  0x17   : > { %p40_p4 = scmp.ge.s32.totalorder %s3600_s26, 2  ;;  %p60_p5 = scmp.ne.s32.totalorder %s2270_s16, %s2266_s15 }
  0x18   : > { %p61_p6 = scmp.eq.s32.totalorder %s2382_s23, 0  ;;  %p170_p7 = scmp.eq.s32.totalorder %s2382_s23, 3 }
  0x19   : > { %s3602_s26 = smov (%p40_p4, %s3600_s26), 0  ;;  %p176_p10 = scmp.eq.s32.totalorder %s1920_s24, 3 }
  0x1a   : > { %3562 = sst [smem:[#allocation19_spill]] %s3602_s26  ;;  %p2406_p8 = por %p61_p6, %p60_p5 }
  0x1b   : > { %p2410_p9 = por %p170_p7, %p54_p1  ;;  %s42_s6 = ssub.s32 %s2290_s21, %s3602_s26 }
  0x1c   : > { %s44_s7 = sor.u32 %s43_s28, %s42_s6  ;;  %p2416_p12 = por %p176_p10, %p60_p5 }
  0x1d   : > { %s3564_s5 = scalar_select %p2410_p9, 1, 0 }
  0x1e   : > { %p45_p11 = scmp.eq.s32.totalorder %s44_s7, 0  ;;  %p1975_p13 = scmp.lt.s32.totalorder %s2294_s22, 4 }
  0x1f   : > { %3565 = sst [smem:[#allocation20_spill]] %s3564_s5  ;;  %s2422_s9 = sand.u32 1, %s2274_s17  }
  0x20   : > { %s3566_s8 = scalar_select %p2416_p12, 1, 0 }
  0x21   : > { %s2425_s10 = scalar_select %p45_p11, %s2274_s17, %s47_s27  }
  0x22   : > { %3567 = sst [smem:[#allocation21_spill]] %s3566_s8  ;;  %s1923_s11 = sshll.u32 %s2422_s9, 5 }
  0x23   : > { %3568 = sst [smem:[#allocation22_spill]] %s2425_s10  ;;  %s3541_s12 = sshll.u32 %s2290_s21, 3 }
  0x24   : > { %s2432_s13 = sadd.s32 %s2286_s20, %s3541_s12  ;;  %p2436_p0 = pnand %p1975_p13, %p2396_p3 }
  0x25   : > { %s1925_s24 = sshll.u32 %s2432_s13, 7  ;;  %s218_s28 = sand.u32 1, %s2294_s22  }
  0x26   : > { %s3570_s1 = sld [smem:[#allocation26_spill]]  ;;  %s222_s26 = scalar_lea.vmem [#allocation5], %s1923_s11 }
  0x27   : > { %s230_s12 = sshll.u32 %s222_s26, 4  ;;  %p1937_p1 = scmp.ge.s32.totalorder %s2294_s22, 1  ;;  %s231_s12 = int_to_ptr.vmem [resolvable:$true] %s230_s12 }
  0x28   : > { %s2450_s29 = scalar_lea.sflag [#allocation6], %s218_s28  ;;  %p2080_p2 = pneg %p2436_p0 }
  0x29   : > { %s2091_s25 = scalar_lea.vmem %s231_s12, 512  ;;  %s2296_s10 = smov [#allocation5]  }
  0x2a   : > { %p2092_p3 = scmp.ne.s32.totalorder %s231_s12, %s2091_s25  ;;  %s2096_s17 = sshll.u32 %s2296_s10, 4  ;;  %s2097_s17 = int_to_ptr.vmem [resolvable:$false] %s2096_s17 }
  0x2b   : > { %s2098_s6 = scalar_lea.vmem %s2097_s17, 1024  ;;  %p2099_p6 = scmp.lt.s32.totalorder %s231_s12, %s2097_s17 }
  0x2c   : > { %s229_s7 = scalar_lea.hbm %s3570_s1, %s1925_s24  ;;  %p2094_p4 = pnand %p2092_p3, %p2080_p2 }
  0x2d   : > { %p2100_p7 = scmp.lt.s32.totalorder %s2098_s6, %s2091_s25 }
  0x2e   : > { %p2095_p5 = pneg %p2094_p4 }
  0x2f   : > { %p2101_p10 = por %p2100_p7, %p2099_p6 }
  0x31   : > { %p2102_p11 = pnand %p2101_p10, %p2095_p5 }
  0x33   : > { %2105 = shalt.err (!%p2102_p11)
}
  0x34   : > { %s2297_s26 = smov 256   ;;  %s2298_s28 = smov 128  }
  0x35   : > { %s2299_s27 = smov 8   ;;  %p284_p13 = scmp.lt.s32.totalorder %s2294_s22, 5 }
  0x36   : > { %1964 = dma.hbm_to_vmem [thread:$0]  (!%p2436_p0), %s229_s7, 512, %s231_s12, %s2450_s29, %s2297_s26, %s2298_s28, %s2299_s27  }
  0x37   : > { %p2464_p3 = pnand %p1937_p1, %p284_p13  ;;  %s3572_s0 = sld [smem:[#allocation25_spill]] }
  0x38   : > { %s200_s1 = scalar_lea.vmem [#allocation2], %s1923_s11  ;;  %s1929_s15 = sshll.u32 %s2422_s9, 3 }
  0x39   : > { %s208_s8 = sshll.u32 %s200_s1, 4  ;;  %s197_s4 = scalar_lea.sflag [#allocation3], %s2422_s9  ;;  %s209_s8 = int_to_ptr.vmem [resolvable:$true] %s208_s8 }
  0x3a   : > { %s2119_s5 = scalar_lea.vmem %s209_s8, 512  ;;  %s2300_s12 = smov [#allocation2]  }
  0x3b   : > { %p2120_p4 = scmp.ne.s32.totalorder %s209_s8, %s2119_s5  ;;  %s2124_s7 = sshll.u32 %s2300_s12, 4  ;;  %s2125_s7 = int_to_ptr.vmem [resolvable:$false] %s2124_s7 }
  0x3c   : > { %s2126_s13 = scalar_lea.vmem %s2125_s7, 1024  ;;  %p2127_p6 = scmp.lt.s32.totalorder %s209_s8, %s2125_s7 }
  0x3d   : > { %s207_s6 = scalar_lea.hbm %s3572_s0, %s1925_s24  ;;  %p2122_p5 = pnand %p2120_p4, %p2080_p2 }
  0x3e   : > { %p2128_p7 = scmp.lt.s32.totalorder %s2126_s13, %s2119_s5 }
  0x3f   : > { %p2123_p1 = pneg %p2122_p5 }
  0x40   : > { %p2129_p10 = por %p2128_p7, %p2127_p6 }
  0x42   : > { %p2130_p11 = pnand %p2129_p10, %p2123_p1 }
  0x44   : > { %2133 = shalt.err (!%p2130_p11)
}
  0x45   : > { %1961 = dma.hbm_to_vmem [thread:$0]  (!%p2436_p0), %s207_s6, 512, %s209_s8, %s197_s4, %s2297_s26, %s2298_s28, %s2299_s27  }
  0x46   : > { %s1930_s1 = sshll.u32 %s2286_s20, 2  ;;  %s3573_s11 = sshll.u32 %s2290_s21, 3 }
  0x47   : > { %s250_s24 = sadd.s32 %s1930_s1, %s3573_s11  ;;  %s244_s25 = scalar_lea.vmem [#allocation7], %s1929_s15 }
  0x48   : > { %s253_s10 = sshll.u32 %s244_s25, 4  ;;  %s1932_s12 = sshll.u32 %s250_s24, 5  ;;  %s254_s10 = int_to_ptr.vmem [resolvable:$true] %s253_s10 }
  0x49   : > { %s252_s13 = scalar_lea.hbm %s3537_s2, %s1932_s12  ;;  %s2147_s0 = scalar_lea.vmem %s254_s10, 128 }
  0x4a   : > { %p2148_p13 = scmp.ne.s32.totalorder %s254_s10, %s2147_s0  ;;  %s2301_s22 = smov [#allocation7]  }
  0x4b   : > { %s2152_s4 = sshll.u32 %s2301_s22, 4  ;;  %s2153_s4 = int_to_ptr.vmem [resolvable:$false] %s2152_s4 }
  0x4c   : > { %p2150_p4 = pnand %p2148_p13, %p2080_p2  ;;  %s2154_s8 = scalar_lea.vmem %s2153_s4, 256 }
  0x4d   : > { %p2155_p1 = scmp.lt.s32.totalorder %s254_s10, %s2153_s4  ;;  %p2156_p6 = scmp.lt.s32.totalorder %s2154_s8, %s2147_s0 }
  0x4e   : > { %p2151_p5 = pneg %p2150_p4 }
  0x4f   : > { %p2157_p7 = por %p2156_p6, %p2155_p1 }
  0x51   : > { %p2158_p10 = pnand %p2157_p7, %p2151_p5 }
  0x53   : > { %2161 = shalt.err (!%p2158_p10)
}
  0x54   : > { %s2302_s26 = smov 32   ;;  %s2303_s28 = smov 2  }
  0x55   : > { %1967 = dma.hbm_to_vmem [thread:$0]  (!%p2436_p0), %s252_s13, 128, %s254_s10, %s2450_s29, %s2302_s26, %s2302_s26, %s2303_s28  }
  0x56   : > { %s275_s22 = scalar_lea.hbm %s3538_s3, %s1932_s12  ;;  %s267_s1 = scalar_lea.vmem [#allocation8], %s1929_s15 }
  0x57   : > { %s276_s11 = sshll.u32 %s267_s1, 4  ;;  %s264_s0 = scalar_lea.sflag [#allocation9], %s2422_s9  ;;  %s277_s11 = int_to_ptr.vmem [resolvable:$true] %s276_s11 }
  0x58   : > { %s2175_s24 = scalar_lea.vmem %s277_s11, 128  ;;  %s2304_s25 = smov [#allocation8]  }
  0x59   : > { %p2176_p11 = scmp.ne.s32.totalorder %s277_s11, %s2175_s24  ;;  %s2180_s5 = sshll.u32 %s2304_s25, 4  ;;  %s2181_s5 = int_to_ptr.vmem [resolvable:$false] %s2180_s5 }
  0x5a   : > { %s2182_s7 = scalar_lea.vmem %s2181_s5, 256  ;;  %p2183_p5 = scmp.lt.s32.totalorder %s277_s11, %s2181_s5 }
  0x5b   : > { %p2178_p13 = pnand %p2176_p11, %p2080_p2  ;;  %p2184_p1 = scmp.lt.s32.totalorder %s2182_s7, %s2175_s24 }
  0x5d   : > { %p2179_p4 = pneg %p2178_p13  ;;  %p2185_p6 = por %p2184_p1, %p2183_p5 }
  0x5f   : > { %p2186_p7 = pnand %p2185_p6, %p2179_p4 }
  0x61   : > { %2189 = shalt.err (!%p2186_p7)
}
  0x62   : > { %1970 = dma.hbm_to_vmem [thread:$0]  (!%p2436_p0), %s275_s22, 128, %s277_s11, %s264_s0, %s2302_s26, %s2302_s26, %s2303_s28  }
  0x63   : > { %288 = sbr.rel (%p2464_p3) target bundleno = 999 (0x3e7), region = 36 }
  0x68   : > { %s2511_s15 = sand.u32 1, %s2270_s16  }
  0x69   : > { %s2514_s9 = sshll.u32 %s2511_s15, 5  ;;  %s291_s29 = scalar_lea.sflag [#allocation3], %s2511_s15 }
  0x6a   : > { %s294_s10 = scalar_lea.vmem [#allocation2], %s2514_s9 }
  0x6b   : > { %2249 = dma.done.wait (%p2406_p8), %s291_s29, 512  }
  0x6c   : > { %2251 = vsyncadd (%p2406_p8), %s291_s29, 4294966784  ;;  %s299_s14 = sand.u32 1, %s2382_s23   ;;  %s2524_s12 = scalar_lea.vmem [#allocation5], %s2514_s9 }
  0x6d   : > { %s300_s17 = scalar_lea.sflag [#allocation6], %s299_s14 }
  0x6e   : > { %2253 = dma.done.wait (%p2406_p8), %s300_s17, 640  }
  0x6f   : > { %2255 = vsyncadd (%p2406_p8), %s300_s17, 4294966656  ;;  %s1940_s13 = sshll.u32 %s2511_s15, 3  ;;  %s318_s8 = scalar_lea.sflag [#allocation9], %s2511_s15 }
  0x70   : > { %s2531_s4 = scalar_lea.vmem [#allocation7], %s1940_s13  ;;  %s2534_s26 = scalar_lea.vmem [#allocation8], %s1940_s13 }
  0x71   : > { %2257 = dma.done.wait (%p2406_p8), %s318_s8, 128  }
  0x72   : > { %2259 = vsyncadd (%p2406_p8), %s318_s8, 4294967168  ;;  %v363_v0 = vld [vmem:[%s294_s10 + $0x10] sm:$0xff]  ;;  %v371_v1 = vld [vmem:[%s2531_s4 + $0x4] sm:$0x3]  ;;  %vm389_vm0 = vcmask 1040384   ;;  %vm430_vm1 = vcmask 1046528  }
  0x73   : > { %v361_v2 = vld [vmem:[%s294_s10] sm:$0xff]  ;;  %v383_v3 = vrot.slane %v363_v0, 7  ;;  %v364_v6 = vld [vmem:[%s294_s10 + $0x18] sm:$0xff]  ;;  %v362_v7 = vld [vmem:[%s294_s10 + $0x8] sm:$0xff]  ;;  %vm451_vm2 = vcmask 1045504   ;;  %s2305_s23 = smov 16  }
  0x74   : > { %v369_v4 = vld [vmem:[%s2531_s4] sm:$0x3]  ;;  %v381_v5 = vrot.slane %v361_v2, 7  ;;  %v384_v8 = vrot.slane %v364_v6, 7  ;;  %v382_v9 = vrot.slane %v362_v7, 7  ;;  %s2306_s30 = smov 15  }
  0x75   : > { %v2543_v10 = vsel %vm389_vm0, %v371_v1, %v383_v3  ;;  %v2546_v11 = vsel %vm389_vm0, %v383_v3, %v371_v1  ;;  %v372_v14 = vld [vmem:[%s2531_s4 + $0x6] sm:$0x3]  ;;  %v370_v27 = vld [vmem:[%s2531_s4 + $0x2] sm:$0x3]  ;;  %v374_v54 = vld [vmem:[%s2534_s26 + $0x2] sm:$0x3] }
  0x76   : > { %v2549_v12 = vsel %vm389_vm0, %v369_v4, %v381_v5  ;;  %v2552_v13 = vsel %vm389_vm0, %v381_v5, %v369_v4  ;;  %v437_v15 = vrot.slane %v2543_v10, 1  ;;  %v438_v16 = vrot.slane %v2546_v11, 1  ;;  %v366_v52 = vld [vmem:[%s2524_s12 + $0x8] sm:$0xff]  ;;  %v365_v55 = vld [vmem:[%s2524_s12] sm:$0xff]  ;;  %v368_v56 = vld [vmem:[%s2524_s12 + $0x18] sm:$0xff]  ;;  %s2307_s28 = smov 114  }
  0x77   : > { %v458_v17 = vrot.slane %v2543_v10, 2  ;;  %v459_v18 = vrot.slane %v2546_v11, 2  ;;  %v431_v19 = vrot.slane %v2549_v12, 1  ;;  %v432_v20 = vrot.slane %v2552_v13, 1  ;;  %v373_v60 = vld [vmem:[%s2534_s26] sm:$0x3] }
  0x78   : > { %v452_v21 = vrot.slane %v2549_v12, 2  ;;  %v453_v22 = vrot.slane %v2552_v13, 2  ;;  %v439_v23 = vsel %vm430_vm1, %v437_v15, %v438_v16  ;;  %v2566_v25 = vsel %vm389_vm0, %v372_v14, %v384_v8  ;;  %v367_v62 = vld [vmem:[%s2524_s12 + $0x10] sm:$0xff]  ;;  %s2308_s27 = smov 14   ;;  %s2311_s6 = smov 113  }
  0x79   : > { %v460_v24 = vsel %vm451_vm2, %v458_v17, %v459_v18  ;;  %v2569_v26 = vsel %vm389_vm0, %v384_v8, %v372_v14  ;;  %v449_v28 = vadd.f32 %v439_v23, %v2543_v10  ;;  %v433_v29 = vsel %vm430_vm1, %v431_v19, %v432_v20  ;;  %v376_v63 = vld [vmem:[%s2534_s26 + $0x6] sm:$0x3]  ;;  %v375_v7 = vld [vmem:[%s2534_s26 + $0x4] sm:$0x3]  ;;  %s360_s22 = scalar_lea.vmem [#allocation10], %s2514_s9  ;;  %s1944_s11 = sshll.u32 %s2282_s19, 3 }
  0x7a   : > { %v454_v30 = vsel %vm451_vm2, %v452_v21, %v453_v22  ;;  %v440_v31 = vrot.slane %v2566_v25, 1  ;;  %v447_v32 = vadd.f32 %v433_v29, %v2549_v12  ;;  %v441_v33 = vrot.slane %v2569_v26, 1  ;;  %s1754_s0 = sadd.s32 %s2278_s18, %s1944_s11  ;;  %s1757_s24 = sshll.u32 %s360_s22, 4  ;;  %s3477_s24 = int_to_ptr.vmem [resolvable:$true] %s1757_s24 }
  0x7b   : > { %v461_v34 = vrot.slane %v2566_v25, 2  ;;  %v462_v35 = vrot.slane %v2569_v26, 2  ;;  %v2580_v36 = vadd.f32 %v460_v24, %v449_v28  ;;  %v2583_v37 = vsel %vm389_vm0, %v370_v27, %v382_v9  ;;  %s1945_s25 = sshll.u32 %s1754_s0, 7  ;;  %s3583_s29 = sld [smem:[#allocation27_spill]] }
  0x7c   : > { %v2586_v38 = vsel %vm389_vm0, %v382_v9, %v370_v27  ;;  %v2588_v39 = vadd.f32 %v454_v30, %v447_v32  ;;  %v442_v40 = vsel %vm430_vm1, %v440_v31, %v441_v33  ;;  %v434_v42 = vrot.slane %v2583_v37, 1  ;;  %s1743_s9 = scalar_lea.sflag [#allocation4], %s2511_s15  ;;  %s2190_s14 = scalar_lea.vmem %s3477_s24, 512 }
  0x7d   : > { %v463_v41 = vsel %vm451_vm2, %v461_v34, %v462_v35  ;;  %479 = vrot.lane.b32.xlu1 %v2580_v36, %s2305_s23  ;;  %v450_v43 = vadd.f32 %v442_v40, %v2566_v25  ;;  %v435_v44 = vrot.slane %v2586_v38, 1  ;;  %v455_v45 = vrot.slane %v2583_v37, 2  ;;  %p2191_p8 = scmp.ne.s32.totalorder %s3477_s24, %s2190_s14  ;;  %s2312_s18 = smov [#allocation10]  }
  0x7e   : > { %v456_v46 = vrot.slane %v2586_v38, 2  ;;  %473 = vrot.lane.b32.xlu0 %v2588_v39, %s2305_s23  ;;  %v403_v53 = vrot.slane %v366_v52, 7  ;;  %v402_v59 = vrot.slane %v365_v55, 7  ;;  %v405_v61 = vrot.slane %v368_v56, 7  ;;  %s2194_s19 = sshll.u32 %s2312_s18, 4  ;;  %s2195_s19 = int_to_ptr.vmem [resolvable:$false] %s2194_s19 }
  0x7f   : > { %v2601_v47 = vadd.f32 %v463_v41, %v450_v43  ;;  %v436_v48 = vsel %vm430_vm1, %v434_v42, %v435_v44  ;;  %v404_v4 = vrot.slane %v367_v62, 7  ;;  %v3551_v44 = vmov 1   ;;  %p2192_p0 = pnand %p2191_p8, %p2410_p9  ;;  %s2196_s17 = scalar_lea.vmem %s2195_s19, 1024 }
  0x80   : > { %v457_v49 = vsel %vm451_vm2, %v455_v45, %v456_v46  ;;  %v448_v50 = vadd.f32 %v436_v48, %v2583_v37  ;;  %v2623_v57 = vsel %vm389_vm0, %v374_v54, %v403_v53  ;;  %v2626_v58 = vsel %vm389_vm0, %v403_v53, %v374_v54  ;;  %2056 = vset.pattern.permute.xlu0 %v3551_v44  ;;  %p2197_p3 = scmp.lt.s32.totalorder %s3477_s24, %s2195_s19  ;;  %p2198_p10 = scmp.lt.s32.totalorder %s2196_s17, %s2190_s14 }
  0x81   : > { %482 = vrot.lane.b32.xlu1 %v2601_v47, %s2305_s23  ;;  %v672_v0 = vrot.slane %v2623_v57, 1  ;;  %v673_v1 = vrot.slane %v2626_v58, 1  ;;  %v2638_v2 = vsel %vm389_vm0, %v373_v60, %v402_v59  ;;  %v2641_v3 = vsel %vm389_vm0, %v402_v59, %v373_v60  ;;  %s3482_s10 = scalar_lea.hbm %s3583_s29, %s1945_s25  ;;  %p2193_p2 = pneg %p2192_p0 }
  0x82   : > { %v2608_v51 = vadd.f32 %v457_v49, %v448_v50  ;;  %v2644_v5 = vsel %vm389_vm0, %v376_v63, %v405_v61  ;;  %v2647_v6 = vsel %vm389_vm0, %v405_v61, %v376_v63  ;;  %v692_v8 = vrot.slane %v2623_v57, 2  ;;  %2057 = vset.pattern.permute.xlu1 %v3551_v44  ;;  %p2199_p11 = por %p2198_p10, %p2197_p3 }
  0x83   : > { %v674_v9 = vsel %vm430_vm1, %v672_v0, %v673_v1  ;;  %v693_v14 = vrot.slane %v2626_v58, 2  ;;  %v669_v15 = vrot.slane %v2638_v2, 1  ;;  %v670_v16 = vrot.slane %v2641_v3, 1 }
  0x84   : > { %476 = vrot.lane.b32.xlu0 %v2608_v51, %s2305_s23  ;;  %v678_v17 = vrot.slane %v2644_v5, 1  ;;  %v679_v18 = vrot.slane %v2647_v6, 1  ;;  %v2662_v19 = vsel %vm389_vm0, %v375_v7, %v404_v4  ;;  %v2665_v20 = vsel %vm389_vm0, %v404_v4, %v375_v7  ;;  %p2200_p13 = pnand %p2199_p11, %p2193_p2 }
  0x85   : > { %503 = vrot.lane.b32.xlu1 %v2608_v51, %s2306_s30  ;;  %v686_v21 = vadd.f32 %v674_v9, %v2623_v57  ;;  %v689_v22 = vrot.slane %v2638_v2, 2  ;;  %v690_v23 = vrot.slane %v2641_v3, 2  ;;  %v694_v24 = vsel %vm451_vm2, %v692_v8, %v693_v14 }
  0x86   : > { %v671_v27 = vsel %vm430_vm1, %v669_v15, %v670_v16  ;;  %v675_v28 = vrot.slane %v2662_v19, 1  ;;  %v676_v29 = vrot.slane %v2665_v20, 1  ;;  %v680_v30 = vsel %vm430_vm1, %v678_v17, %v679_v18 }
  0x87   : > { %v698_v31 = vrot.slane %v2644_v5, 2  ;;  %v699_v32 = vrot.slane %v2647_v6, 2  ;;  %v2683_v33 = vadd.f32 %v694_v24, %v686_v21  ;;  %v685_v34 = vadd.f32 %v671_v27, %v2638_v2 }
  0x88   : > { %501 = vrot.lane.b32.xlu0 %v2588_v39, %s2306_s30  ;;  %v691_v35 = vsel %vm451_vm2, %v689_v22, %v690_v23  ;;  %v688_v40 = vadd.f32 %v680_v30, %v2644_v5  ;;  %v677_v41 = vsel %vm430_vm1, %v675_v28, %v676_v29  ;;  %v695_v42 = vrot.slane %v2662_v19, 2 }
  0x89   : > { %507 = vrot.lane.b32.xlu1 %v2601_v47, %s2306_s30  ;;  %v696_v43 = vrot.slane %v2665_v20, 2  ;;  %v700_v45 = vsel %vm451_vm2, %v698_v31, %v699_v32  ;;  %v2698_v46 = vadd.f32 %v691_v35, %v685_v34  ;;  %v687_v48 = vadd.f32 %v677_v41, %v2662_v19 }
  0x8a   : > { %v2703_v49 = vadd.f32 %v700_v45, %v688_v40  ;;  %v899_v53 = vmul.f32 %v2583_v37, %v2583_v37  ;;  %v900_v54 = vmul.f32 %v2586_v38, %v2586_v38  ;;  %v897_v55 = vmul.f32 %v2549_v12, %v2549_v12 }
  0x8b   : > { %v697_v50 = vsel %vm451_vm2, %v695_v42, %v696_v43  ;;  %v898_v56 = vmul.f32 %v2552_v13, %v2552_v13  ;;  %v903_v61 = vmul.f32 %v2566_v25, %v2566_v25  ;;  %v904_v62 = vmul.f32 %v2569_v26, %v2569_v26 }
  0x8c   : > { %505 = vrot.lane.b32.xlu0 %v2580_v36, %s2306_s30  ;;  %v2708_v52 = vadd.f32 %v697_v50, %v687_v48  ;;  %v916_v59 = vrot.slane %v899_v53, 1  ;;  %v917_v60 = vrot.slane %v900_v54, 1  ;;  %v913_v63 = vrot.slane %v897_v55, 1 }
  0x8d   : > { %539 = vrot.lane.b32.xlu1 %v2608_v51, %s2307_s28  ;;  %v914_v0 = vrot.slane %v898_v56, 1  ;;  %v936_v1 = vrot.slane %v899_v53, 2  ;;  %v901_v4 = vmul.f32 %v2543_v10, %v2543_v10  ;;  %v902_v7 = vmul.f32 %v2546_v11, %v2546_v11 }
  0x8e   : > { %v918_v8 = vsel %vm430_vm1, %v916_v59, %v917_v60  ;;  %v937_v9 = vrot.slane %v900_v54, 2  ;;  %v922_v14 = vrot.slane %v903_v61, 1  ;;  %v923_v15 = vrot.slane %v904_v62, 1 }
  0x8f   : > { %v933_v16 = vrot.slane %v897_v55, 2  ;;  %v934_v17 = vrot.slane %v898_v56, 2  ;;  %v915_v18 = vsel %vm430_vm1, %v913_v63, %v914_v0  ;;  %v930_v21 = vadd.f32 %v918_v8, %v899_v53 }
  0x90   : > { %537 = vrot.lane.b32.xlu0 %v2588_v39, %s2307_s28  ;;  %v919_v22 = vrot.slane %v901_v4, 1  ;;  %v920_v23 = vrot.slane %v902_v7, 1  ;;  %v938_v24 = vsel %vm451_vm2, %v936_v1, %v937_v9  ;;  %v924_v27 = vsel %vm430_vm1, %v922_v14, %v923_v15 }
  0x91   : > { %543 = vrot.lane.b32.xlu1 %v2601_v47, %s2307_s28  ;;  %v942_v28 = vrot.slane %v903_v61, 2  ;;  %v943_v29 = vrot.slane %v904_v62, 2  ;;  %v929_v30 = vadd.f32 %v915_v18, %v897_v55  ;;  %v935_v31 = vsel %vm451_vm2, %v933_v16, %v934_v17 }
  0x92   : > { %v939_v32 = vrot.slane %v901_v4, 2  ;;  %v2757_v34 = vadd.f32 %v938_v24, %v930_v21  ;;  %v932_v35 = vadd.f32 %v924_v27, %v903_v61  ;;  %v921_v40 = vsel %vm430_vm1, %v919_v22, %v920_v23 }
  0x93   : > { %v940_v41 = vrot.slane %v902_v7, 2  ;;  %v944_v42 = vsel %vm451_vm2, %v942_v28, %v943_v29  ;;  %v2763_v43 = vadd.f32 %v935_v31, %v929_v30  ;;  %v931_v45 = vadd.f32 %v921_v40, %v901_v4 }
  0x94   : > { %541 = vrot.lane.b32.xlu0 %v2580_v36, %s2307_s28  ;;  %v2767_v48 = vadd.f32 %v944_v42, %v932_v35  ;;  %vm472_vm3 = vcmask 1047680   ;;  %vm1737_vm6 = vcmask 130048  }
  0x95   : > { %555 = vrot.lane.b32.xlu1 %v2608_v51, %s2308_s27  ;;  %v941_v50 = vsel %vm451_vm2, %v939_v32, %v940_v41 }
  0x96   : > { %v2772_v53 = vadd.f32 %v941_v50, %v931_v45 }
  0x98   : > { %553 = vrot.lane.b32.xlu0 %v2588_v39, %s2308_s27 }
  0x99   : > { %559 = vrot.lane.b32.xlu1 %v2601_v47, %s2308_s27 }
  0x9c   : > { %557 = vrot.lane.b32.xlu0 %v2580_v36, %s2308_s27 }
  0x9d   : > { %712 = vrot.lane.b32.xlu1 %v2683_v33, %s2305_s23 }
  0xa0   : > { %709 = vrot.lane.b32.xlu0 %v2698_v46, %s2305_s23 }
  0xa1   : > { %718 = vrot.lane.b32.xlu1 %v2703_v49, %s2305_s23 }
  0xa4   : > { %715 = vrot.lane.b32.xlu0 %v2708_v52, %s2305_s23 }
  0xa5   : > { %739 = vrot.lane.b32.xlu1 %v2683_v33, %s2306_s30 }
  0xa8   : > { %737 = vrot.lane.b32.xlu0 %v2698_v46, %s2306_s30 }
  0xa9   : > { %743 = vrot.lane.b32.xlu1 %v2703_v49, %s2306_s30 }
  0xac   : > { %741 = vrot.lane.b32.xlu0 %v2708_v52, %s2306_s30 }
  0xad   : > { %775 = vrot.lane.b32.xlu1 %v2683_v33, %s2307_s28 }
  0xb0   : > { %773 = vrot.lane.b32.xlu0 %v2698_v46, %s2307_s28 }
  0xb1   : > { %779 = vrot.lane.b32.xlu1 %v2703_v49, %s2307_s28 }
  0xb4   : > { %777 = vrot.lane.b32.xlu0 %v2708_v52, %s2307_s28 }
  0xb5   : > { %791 = vrot.lane.b32.xlu1 %v2683_v33, %s2308_s27 }
  0xb8   : > { %789 = vrot.lane.b32.xlu0 %v2698_v46, %s2308_s27 }
  0xb9   : > { %795 = vrot.lane.b32.xlu1 %v2703_v49, %s2308_s27 }
  0xbc   : > { %793 = vrot.lane.b32.xlu0 %v2708_v52, %s2308_s27 }
  0xbd   : > { %956 = vrot.lane.b32.xlu1 %v2757_v34, %s2305_s23 }
  0xc0   : > { %953 = vrot.lane.b32.xlu0 %v2763_v43, %s2305_s23 }
  0xc1   : > { %962 = vrot.lane.b32.xlu1 %v2767_v48, %s2305_s23 }
  0xc4   : > { %959 = vrot.lane.b32.xlu0 %v2772_v53, %s2305_s23 }
  0xc5   : > { %1017 = vrot.lane.b32.xlu1 %v2763_v43, %s2307_s28 }
  0xc8   : > { %981 = vrot.lane.b32.xlu0 %v2763_v43, %s2306_s30 }
  0xef   : > { %v480_v54 = vpop.permute.xlu1 %479 }
  0xf0   : > { %v474_v55 = vpop.permute.xlu0 %473  ;;  %v481_v60 = vsel %vm472_vm3, %v480_v54, %v2580_v36 }
  0xf1   : > { %v475_v56 = vsel %vm472_vm3, %v474_v55, %v2588_v39 }
  0xf2   : > { %485 = vrot.lane.b32.xlu0 %v475_v56, %s2305_s23 }
  0xf3   : > { %v483_v59 = vpop.permute.xlu1 %482 }
  0xf4   : > { %v484_v1 = vsel %vm472_vm3, %v483_v59, %v2601_v47  ;;  %v3552_v59 = vmov 14  }
  0xf6   : > { %v477_v61 = vpop.permute.xlu0 %476  ;;  %489 = vrot.lane.b32.xlu0 %v481_v60, %s2305_s23 }
  0xf7   : > { %v478_v62 = vsel %vm472_vm3, %v477_v61, %v2608_v51  ;;  %v2790_v63 = vpop.permute.xlu1 %503 }
  0xf8   : > { %487 = vrot.lane.b32.xlu1 %v478_v62, %s2305_s23 }
  0xfa   : > { %v2793_v0 = vpop.permute.xlu0 %501 }
  0xfb   : > { %v2797_v4 = vpop.permute.xlu1 %507 }
  0xfc   : > { %491 = vrot.lane.b32.xlu1 %v484_v1, %s2305_s23 }
  0xfe   : > { %v2800_v7 = vpop.permute.xlu0 %505 }
  0xff   : > { %v540_v8 = vpop.permute.xlu1 %539 }
 0x100   : > { %v550_v31 = vsub.f32 %v2608_v51, %v540_v8 }
 0x102   : > { %v538_v9 = vpop.permute.xlu0 %537 }
 0x103   : > { %v544_v14 = vpop.permute.xlu1 %543  ;;  %v549_v40 = vsub.f32 %v2588_v39, %v538_v9 }
 0x104   : > { %v552_v50 = vsub.f32 %v2601_v47, %v544_v14 }
 0x106   : > { %v542_v15 = vpop.permute.xlu0 %541 }
 0x107   : > { %v556_v16 = vpop.permute.xlu1 %555  ;;  %v551_v42 = vsub.f32 %v2580_v36, %v542_v15 }
 0x108   : > { %v566_v61 = vsub.f32 %v2608_v51, %v556_v16 }
 0x10a   : > { %v554_v17 = vpop.permute.xlu0 %553 }
 0x10b   : > { %v560_v18 = vpop.permute.xlu1 %559  ;;  %v565_v55 = vsub.f32 %v2588_v39, %v554_v17 }
 0x10c   : > { %v568_v14 = vsub.f32 %v2601_v47, %v560_v18 }
 0x10e   : > { %v558_v21 = vpop.permute.xlu0 %557 }
 0x10f   : > { %v713_v22 = vpop.permute.xlu1 %712  ;;  %v567_v62 = vsub.f32 %v2580_v36, %v558_v21 }
 0x110   : > { %v714_v23 = vsel %vm472_vm3, %v713_v22, %v2683_v33 }
 0x111   : > { %723 = vrot.lane.b32.xlu1 %v714_v23, %s2305_s23 }
 0x112   : > { %v710_v24 = vpop.permute.xlu0 %709 }
 0x113   : > { %v711_v27 = vsel %vm472_vm3, %v710_v24, %v2698_v46  ;;  %v719_v28 = vpop.permute.xlu1 %718 }
 0x114   : > { %721 = vrot.lane.b32.xlu0 %v711_v27, %s2305_s23  ;;  %v720_v29 = vsel %vm472_vm3, %v719_v28, %v2703_v49  ;;  %v1151_v27 = vmul.f32 %v2623_v57, %v2623_v57  ;;  %v1152_v28 = vmul.f32 %v2626_v58, %v2626_v58 }
 0x115   : > { %727 = vrot.lane.b32.xlu1 %v720_v29, %s2305_s23 }
 0x116   : > { %v716_v30 = vpop.permute.xlu0 %715 }
 0x117   : > { %v717_v32 = vsel %vm472_vm3, %v716_v30, %v2708_v52  ;;  %v2814_v35 = vpop.permute.xlu1 %739 }
 0x118   : > { %3574 = vst [vmem:[#allocation23_spill] sm:$0xff] %v2814_v35  ;;  %725 = vrot.lane.b32.xlu0 %v717_v32, %s2305_s23 }
 0x119   : > { %576 = vperm.xlu1 %2057, %v550_v31  }
 0x11a   : > { %v2818_v41 = vpop.permute.xlu0 %737 }
 0x11b   : > { %v2821_v45 = vpop.permute.xlu1 %743 }
 0x11c   : > { %571 = vperm.xlu0 %2056, %v549_v40   ;;  %v1168_v40 = vrot.slane %v1151_v27, 1 }
 0x11d   : > { %581 = vperm.xlu1 %2057, %v551_v42   ;;  %v1169_v42 = vrot.slane %v1152_v28, 1 }
 0x11e   : > { %v2824_v54 = vpop.permute.xlu0 %741 }
 0x11f   : > { %v776_v56 = vpop.permute.xlu1 %775 }
 0x120   : > { %586 = vperm.xlu0 %2056, %v552_v50   ;;  %v786_v16 = vsub.f32 %v2683_v33, %v776_v56  ;;  %v1155_v50 = vmul.f32 %v2644_v5, %v2644_v5 }
 0x121   : > { %2058 = vset.pattern.permute.xlu1 %v3552_v59 }
 0x122   : > { %615 = vperm.xlu1 %2058, %v565_v55   ;;  %v774_v60 = vpop.permute.xlu0 %773 }
 0x123   : > { %v785_v1 = vsub.f32 %v2698_v46, %v774_v60  ;;  %v780_v8 = vpop.permute.xlu1 %779  ;;  %v1156_v60 = vmul.f32 %v2647_v6, %v2647_v6 }
 0x124   : > { %2059 = vset.pattern.permute.xlu0 %v3552_v59  ;;  %v788_v15 = vsub.f32 %v2703_v49, %v780_v8 }
 0x125   : > { %620 = vperm.xlu0 %2059, %v566_v61   ;;  %v1149_v61 = vmul.f32 %v2638_v2, %v2638_v2 }
 0x126   : > { %625 = vperm.xlu1 %2058, %v567_v62   ;;  %v778_v9 = vpop.permute.xlu0 %777  ;;  %v1170_v62 = vsel %vm430_vm1, %v1168_v40, %v1169_v42 }
 0x127   : > { %v792_v21 = vpop.permute.xlu1 %791  ;;  %v787_v24 = vsub.f32 %v2708_v52, %v778_v9 }
 0x128   : > { %v802_v23 = vsub.f32 %v2683_v33, %v792_v21  ;;  %v1165_v21 = vrot.slane %v1149_v61, 1 }
 0x129   : > { %2060 = vset.pattern.permute.xlu0 %v3551_v44 }
 0x12a   : > { %807 = vperm.xlu0 %2060, %v785_v1   ;;  %630 = vperm.xlu1 %2058, %v568_v14   ;;  %v790_v17 = vpop.permute.xlu0 %789  ;;  %v1188_v1 = vrot.slane %v1151_v27, 2  ;;  %v1189_v14 = vrot.slane %v1152_v28, 2 }
 0x12b   : > { %v801_v29 = vsub.f32 %v2698_v46, %v790_v17  ;;  %v796_v31 = vpop.permute.xlu1 %795  ;;  %v1175_v17 = vrot.slane %v1156_v60, 1 }
 0x12c   : > { %v804_v8 = vsub.f32 %v2703_v49, %v796_v31  ;;  %v1153_v31 = vmul.f32 %v2662_v19, %v2662_v19 }
 0x12e   : > { %822 = vperm.xlu0 %2060, %v788_v15   ;;  %2061 = vset.pattern.permute.xlu1 %v3551_v44  ;;  %v794_v22 = vpop.permute.xlu0 %793  ;;  %v1174_v15 = vrot.slane %v1155_v50, 1 }
 0x12f   : > { %812 = vperm.xlu1 %2061, %v786_v16   ;;  %v803_v55 = vsub.f32 %v2708_v52, %v794_v22  ;;  %v957_v9 = vpop.permute.xlu1 %956  ;;  %v1150_v16 = vmul.f32 %v2641_v3, %v2641_v3  ;;  %v1182_v22 = vadd.f32 %v1170_v62, %v1151_v27 }
 0x130   : > { %v958_v28 = vsel %vm472_vm3, %v957_v9, %v2757_v34 }
 0x132   : > { %2063 = vset.pattern.permute.xlu0 %v3552_v59  ;;  %v954_v18 = vpop.permute.xlu0 %953 }
 0x133   : > { %856 = vperm.xlu0 %2063, %v802_v23   ;;  %817 = vperm.xlu1 %2061, %v787_v24   ;;  %v955_v30 = vsel %vm472_vm3, %v954_v18, %v2763_v43  ;;  %v1190_v23 = vsel %vm451_vm2, %v1188_v1, %v1189_v14  ;;  %v1176_v24 = vsel %vm430_vm1, %v1174_v15, %v1175_v17  ;;  %v1194_v18 = vrot.slane %v1155_v50, 2  ;;  %v963_v40 = vpop.permute.xlu1 %962 }
 0x134   : > { %v2876_v27 = vadd.f32 %v1190_v23, %v1182_v22  ;;  %v1184_v42 = vadd.f32 %v1176_v24, %v1155_v50  ;;  %v964_v62 = vsel %vm472_vm3, %v963_v40, %v2767_v48 }
 0x136   : > { %v960_v32 = vpop.permute.xlu0 %959 }
 0x137   : > { %2062 = vset.pattern.permute.xlu1 %v3552_v59  ;;  %965 = vrot.lane.b32.xlu0 %v955_v30, %s2305_s23  ;;  %v961_v56 = vsel %vm472_vm3, %v960_v32, %v2772_v53  ;;  %v1166_v30 = vrot.slane %v1150_v16, 1  ;;  %v1154_v32 = vmul.f32 %v2665_v20, %v2665_v20 }
 0x138   : > { %851 = vperm.xlu1 %2062, %v801_v29   ;;  %2065 = vset.pattern.permute.xlu0 %v3551_v44  ;;  %v1195_v29 = vrot.slane %v1156_v60, 2 }
 0x139   : > { %v1167_v1 = vsel %vm430_vm1, %v1165_v21, %v1166_v30  ;;  %v1172_v9 = vrot.slane %v1154_v32, 1  ;;  %v1192_v22 = vrot.slane %v1154_v32, 2 }
 0x13a   : > { %v1196_v60 = vsel %vm451_vm2, %v1194_v18, %v1195_v29  ;;  %v1181_v50 = vadd.f32 %v1167_v1, %v1149_v61  ;;  %v1403_v18 = vmul.f32 %v2623_v57, %v2583_v37  ;;  %v1404_v29 = vmul.f32 %v2626_v58, %v2586_v38 }
 0x13b   : > { %969 = vrot.lane.b32.xlu0 %v961_v56, %s2305_s23  ;;  %v1186_v56 = vrot.slane %v1150_v16, 2  ;;  %v2886_v14 = vadd.f32 %v1196_v60, %v1184_v42  ;;  %v1191_v16 = vrot.slane %v1153_v31, 2  ;;  %v1408_v37 = vmul.f32 %v2647_v6, %v2569_v26 }
 0x13c   : > { %861 = vperm.xlu1 %2062, %v803_v55   ;;  %v1185_v55 = vrot.slane %v1149_v61, 2  ;;  %v1421_v30 = vrot.slane %v1404_v29, 1  ;;  %v1401_v38 = vmul.f32 %v2638_v2, %v2549_v12  ;;  %v1402_v57 = vmul.f32 %v2641_v3, %v2552_v13 }
 0x13d   : > { %v1193_v24 = vsel %vm451_vm2, %v1191_v16, %v1192_v22  ;;  %v1440_v32 = vrot.slane %v1403_v18, 2  ;;  %v1441_v40 = vrot.slane %v1404_v29, 2  ;;  %v1447_v6 = vrot.slane %v1408_v37, 2 }
 0x13e   : > { %v1187_v15 = vsel %vm451_vm2, %v1185_v55, %v1186_v56  ;;  %v1417_v42 = vrot.slane %v1401_v38, 1  ;;  %v1418_v26 = vrot.slane %v1402_v57, 1  ;;  %v1405_v55 = vmul.f32 %v2662_v19, %v2543_v10 }
 0x13f   : > { %1019 = vrot.lane.b32.xlu0 %v2757_v34, %s2307_s28  ;;  %v2895_v21 = vadd.f32 %v1187_v15, %v1181_v50  ;;  %v1442_v13 = vsel %vm451_vm2, %v1440_v32, %v1441_v40  ;;  %v1406_v56 = vmul.f32 %v2665_v20, %v2546_v11  ;;  %v1438_v50 = vrot.slane %v1402_v57, 2 }
 0x140   : > { %866 = vperm.xlu1 %2062, %v804_v8   ;;  %v1171_v8 = vrot.slane %v1153_v31, 1  ;;  %v1419_v1 = vsel %vm430_vm1, %v1417_v42, %v1418_v26  ;;  %v1423_v15 = vrot.slane %v1405_v55, 1  ;;  %v1443_v16 = vrot.slane %v1405_v55, 2 }
 0x141   : > { %v1424_v10 = vrot.slane %v1406_v56, 1  ;;  %v1433_v19 = vadd.f32 %v1419_v1, %v1401_v38  ;;  %v1444_v22 = vrot.slane %v1406_v56, 2 }
 0x142   : > { %v1173_v17 = vsel %vm430_vm1, %v1171_v8, %v1172_v9  ;;  %v1437_v9 = vrot.slane %v1401_v38, 2 }
 0x143   : > { %1023 = vrot.lane.b32.xlu0 %v2767_v48, %s2307_s28  ;;  %v1183_v23 = vadd.f32 %v1173_v17, %v1153_v31  ;;  %v1407_v31 = vmul.f32 %v2644_v5, %v2566_v25  ;;  %v1427_v5 = vrot.slane %v1408_v37, 1  ;;  %v1425_v17 = vsel %vm430_vm1, %v1423_v15, %v1424_v10 }
 0x144   : > { %967 = vrot.lane.b32.xlu1 %v958_v28, %s2305_s23  ;;  %v1420_v28 = vrot.slane %v1403_v18, 1  ;;  %v1439_v20 = vsel %vm451_vm2, %v1437_v9, %v1438_v50 }
 0x145   : > { %2064 = vset.pattern.permute.xlu1 %v3551_v44  ;;  %v2902_v61 = vadd.f32 %v1193_v24, %v1183_v23  ;;  %v1426_v25 = vrot.slane %v1407_v31, 1  ;;  %v1446_v3 = vrot.slane %v1407_v31, 2  ;;  %v2959_v23 = vadd.f32 %v1439_v20, %v1433_v19 }
 0x146   : > { %v1422_v58 = vsel %vm430_vm1, %v1420_v28, %v1421_v30  ;;  %v1435_v24 = vadd.f32 %v1425_v17, %v1405_v55  ;;  %v1018_v28 = vpop.permute.xlu1 %1017  ;;  %v2980_v30 = vpop.permute.xlu0 %981 }
 0x147   : > { %1271 = vrot.lane.b32.xlu0 %v2876_v27, %s2307_s28  ;;  %v1434_v12 = vadd.f32 %v1422_v58, %v1403_v18  ;;  %v1428_v2 = vsel %vm430_vm1, %v1426_v25, %v1427_v5  ;;  %v1448_v8 = vsel %vm451_vm2, %v1446_v3, %v1447_v6  ;;  %v1445_v18 = vsel %vm451_vm2, %v1443_v16, %v1444_v22 }
 0x148   : > { %971 = vrot.lane.b32.xlu1 %v964_v62, %s2305_s23  ;;  %v1436_v62 = vadd.f32 %v1428_v2, %v1407_v31  ;;  %v2966_v29 = vadd.f32 %v1445_v18, %v1435_v24  ;;  %3575 = vst [vmem:[#allocation24_spill] sm:$0xff] %v2980_v30  ;;  %v1029_v38 = vsub.f32 %v2763_v43, %v1018_v28 }
 0x149   : > { %v2941_v60 = vadd.f32 %v1442_v13, %v1434_v12 }
 0x14a   : > { %v2949_v11 = vadd.f32 %v1448_v8, %v1436_v62 }
 0x14b   : > { %1275 = vrot.lane.b32.xlu0 %v2886_v14, %s2307_s28 }
 0x14c   : > { %1021 = vrot.lane.b32.xlu1 %v2772_v53, %s2307_s28 }
 0x14f   : > { %1035 = vrot.lane.b32.xlu0 %v2757_v34, %s2308_s27 }
 0x150   : > { %1269 = vrot.lane.b32.xlu1 %v2895_v21, %s2307_s28 }
 0x153   : > { %1039 = vrot.lane.b32.xlu0 %v2767_v48, %s2308_s27 }
 0x154   : > { %1273 = vrot.lane.b32.xlu1 %v2902_v61, %s2307_s28 }
 0x157   : > { %1287 = vrot.lane.b32.xlu0 %v2876_v27, %s2308_s27 }
 0x158   : > { %1033 = vrot.lane.b32.xlu1 %v2763_v43, %s2308_s27 }
 0x15b   : > { %1291 = vrot.lane.b32.xlu0 %v2886_v14, %s2308_s27 }
 0x15c   : > { %1037 = vrot.lane.b32.xlu1 %v2772_v53, %s2308_s27 }
 0x15f   : > { %1208 = vrot.lane.b32.xlu0 %v2876_v27, %s2305_s23 }
 0x160   : > { %1285 = vrot.lane.b32.xlu1 %v2895_v21, %s2308_s27 }
 0x163   : > { %1214 = vrot.lane.b32.xlu0 %v2886_v14, %s2305_s23 }
 0x164   : > { %1289 = vrot.lane.b32.xlu1 %v2902_v61, %s2308_s27  ;;  %v486_v37 = vpop.permute.xlu0 %485 }
 0x167   : > { %1523 = vrot.lane.b32.xlu0 %v2941_v60, %s2307_s28 }
 0x168   : > { %1205 = vrot.lane.b32.xlu1 %v2895_v21, %s2305_s23  ;;  %v490_v58 = vpop.permute.xlu0 %489 }
 0x16a   : > { %v488_v31 = vpop.permute.xlu1 %487 }
 0x16b   : > { %1527 = vrot.lane.b32.xlu0 %v2949_v11, %s2307_s28 }
 0x16c   : > { %1211 = vrot.lane.b32.xlu1 %v2902_v61, %s2305_s23 }
 0x16e   : > { %v492_v57 = vpop.permute.xlu1 %491 }
 0x16f   : > { %1539 = vrot.lane.b32.xlu0 %v2941_v60, %s2308_s27 }
 0x170   : > { %1521 = vrot.lane.b32.xlu1 %v2959_v23, %s2307_s28 }
 0x173   : > { %1543 = vrot.lane.b32.xlu0 %v2949_v11, %s2308_s27 }
 0x174   : > { %1525 = vrot.lane.b32.xlu1 %v2966_v29, %s2307_s28 }
 0x177   : > { %1460 = vrot.lane.b32.xlu0 %v2941_v60, %s2305_s23 }
 0x178   : > { %1537 = vrot.lane.b32.xlu1 %v2959_v23, %s2308_s27 }
 0x17b   : > { %1466 = vrot.lane.b32.xlu0 %v2949_v11, %s2305_s23 }
 0x17c   : > { %1541 = vrot.lane.b32.xlu1 %v2966_v29, %s2308_s27 }
 0x180   : > { %1457 = vrot.lane.b32.xlu1 %v2959_v23, %s2305_s23 }
 0x183   : > { %v724_v32 = vpop.permute.xlu1 %723 }
 0x184   : > { %1463 = vrot.lane.b32.xlu1 %v2966_v29, %s2305_s23 }
 0x186   : > { %v722_v40 = vpop.permute.xlu0 %721 }
 0x187   : > { %v728_v25 = vpop.permute.xlu1 %727 }
 0x188   : > { %1051 = vperm.xlu1 %2064, %v1029_v38  }
 0x18a   : > { %v726_v5 = vpop.permute.xlu0 %725 }
 0x194   : > { %v577_v42 = vpop.permute.xlu1 %576 }
 0x197   : > { %v572_v26 = vpop.permute.xlu0 %571 }
 0x198   : > { %v582_v12 = vpop.permute.xlu1 %581 }
 0x19b   : > { %v587_v13 = vpop.permute.xlu0 %586 }
 0x19d   : > { %v616_v2 = vpop.permute.xlu1 %615 }
 0x1a0   : > { %v2987_v3 = vpop.permute.xlu0 %620 }
 0x1a1   : > { %v2989_v6 = vpop.permute.xlu1 %625 }
 0x1a5   : > { %v2991_v55 = vpop.permute.xlu0 %807  ;;  %v2993_v56 = vpop.permute.xlu1 %630 }
 0x1a9   : > { %v2995_v62 = vpop.permute.xlu0 %822 }
 0x1aa   : > { %v2997_v1 = vpop.permute.xlu1 %812 }
 0x1ae   : > { %v2999_v8 = vpop.permute.xlu0 %856  ;;  %v3001_v9 = vpop.permute.xlu1 %817 }
 0x1b2   : > { %v3003_v50 = vpop.permute.xlu0 %965 }
 0x1b3   : > { %v3005_v15 = vpop.permute.xlu1 %851 }
 0x1b6   : > { %v3007_v10 = vpop.permute.xlu0 %969 }
 0x1b7   : > { %v3009_v19 = vpop.permute.xlu1 %861 }
 0x1ba   : > { %v1020_v20 = vpop.permute.xlu0 %1019 }
 0x1bb   : > { %v3011_v17 = vpop.permute.xlu1 %866  ;;  %v1030_v16 = vsub.f32 %v2757_v34, %v1020_v20 }
 0x1bd   : > { %1056 = vperm.xlu0 %2065, %v1030_v16   ;;  %v3024_v16 = vsel %vm472_vm3, %v486_v37, %v2588_v39  ;;  %v3042_v39 = vsel %vm472_vm3, %v492_v57, %v2601_v47  ;;  %v3060_v47 = vsel %vm472_vm3, %v726_v5, %v2708_v52 }
 0x1be   : > { %v1024_v18 = vpop.permute.xlu0 %1023 }
 0x1bf   : > { %v3014_v22 = vpop.permute.xlu1 %967  ;;  %v1032_v44 = vsub.f32 %v2767_v48, %v1024_v18  ;;  %v3034_v18 = vsel %vm472_vm3, %v490_v58, %v2580_v36  ;;  %v3056_v36 = vsel %vm472_vm3, %v724_v32, %v2683_v33 }
 0x1c2   : > { %v1272_v30 = vpop.permute.xlu0 %1271 }
 0x1c3   : > { %v3016_v24 = vpop.permute.xlu1 %971  ;;  %v1282_v20 = vsub.f32 %v2876_v27, %v1272_v30 }
 0x1c7   : > { %v1022_v28 = vpop.permute.xlu1 %1021 }
 0x1c8   : > { %v1031_v38 = vsub.f32 %v2772_v53, %v1022_v28  ;;  %v3030_v28 = vsel %vm472_vm3, %v488_v31, %v2608_v51 }
 0x1ca   : > { %1061 = vperm.xlu1 %2064, %v1031_v38  }
 0x1cb   : > { %v1270_v59 = vpop.permute.xlu1 %1269 }
 0x1cc   : > { %v1281_v35 = vsub.f32 %v2895_v21, %v1270_v59  ;;  %v1276_v59 = vpop.permute.xlu0 %1275 }
 0x1ce   : > { %1303 = vperm.xlu0 %2065, %v1281_v35   ;;  %1066 = vperm.xlu1 %2064, %v1032_v44   ;;  %v418_v35 = vlaneseq  ;;  %v3046_v44 = vsel %vm472_vm3, %v722_v40, %v2698_v46  ;;  %v3069_v46 = vsel %vm472_vm3, %v728_v25, %v2703_v49 }
 0x1cf   : > { %v1274_v49 = vpop.permute.xlu1 %1273 }
 0x1d0   : > { %v3048_v51 = vand.u32 127, %v418_v35  ;;  %v1036_v52 = vpop.permute.xlu0 %1035 }
 0x1d2   : > { %521 = vrot.lane.b32.xlu0 %v3024_v16, %s2308_s27  ;;  %1308 = vperm.xlu1 %2064, %v1282_v20   ;;  %vm420_vm4 = vcmp.eq.s32.totalorder %v3048_v51, 0  ;;  %vm421_vm5 = vcmp.eq.s32.totalorder %v3048_v51, 15 }
 0x1d3   : > { %v590_v33 = vsel %vm420_vm4, %v577_v42, 0.0  ;;  %v589_v30 = vsel %vm420_vm4, %v572_v26, 0.0  ;;  %v592_v31 = vsel %vm420_vm4, %v587_v13, 0.0  ;;  %v591_v37 = vsel %vm420_vm4, %v582_v12, 0.0  ;;  %v1034_v25 = vpop.permute.xlu1 %1033 }
 0x1d4   : > { %v633_v57 = vsel %vm421_vm5, %v616_v2, 0.0  ;;  %v1040_v58 = vpop.permute.xlu0 %1039  ;;  %v634_v32 = vsel %vm421_vm5, %v2987_v3, 0.0  ;;  %v635_v40 = vsel %vm421_vm5, %v2989_v6, 0.0  ;;  %v636_v42 = vsel %vm421_vm5, %v2993_v56, 0.0 }
 0x1d5   : > { %v826_v26 = vsel %vm420_vm4, %v2997_v1, 0.0  ;;  %v825_v13 = vsel %vm420_vm4, %v2991_v55, 0.0  ;;  %v828_v2 = vsel %vm420_vm4, %v2995_v62, 0.0  ;;  %v827_v6 = vsel %vm420_vm4, %v3001_v9, 0.0 }
 0x1d6   : > { %525 = vrot.lane.b32.xlu0 %v3034_v18, %s2308_s27  ;;  %523 = vrot.lane.b32.xlu1 %v3030_v28, %s2308_s27  ;;  %v869_v56 = vsel %vm421_vm5, %v3005_v15, 0.0  ;;  %v870_v62 = vsel %vm421_vm5, %v2999_v8, 0.0  ;;  %v871_v38 = vsel %vm421_vm5, %v3009_v19, 0.0  ;;  %v1283_v9 = vsub.f32 %v2902_v61, %v1274_v49 }
 0x1d7   : > { %v1038_v12 = vpop.permute.xlu1 %1037  ;;  %v872_v20 = vsel %vm421_vm5, %v3011_v17, 0.0  ;;  %v3576_v17 = vmov 14  }
 0x1d8   : > { %v1288_v5 = vpop.permute.xlu0 %1287 }
 0x1da   : > { %757 = vrot.lane.b32.xlu0 %v3046_v44, %s2308_s27  ;;  %527 = vrot.lane.b32.xlu1 %v3042_v39, %s2308_s27 }
 0x1db   : > { %v1286_v1 = vpop.permute.xlu1 %1285 }
 0x1dc   : > { %v1292_v3 = vpop.permute.xlu0 %1291 }
 0x1de   : > { %761 = vrot.lane.b32.xlu0 %v3060_v47, %s2308_s27  ;;  %759 = vrot.lane.b32.xlu1 %v3056_v36, %s2308_s27 }
 0x1df   : > { %v1290_v15 = vpop.permute.xlu1 %1289 }
 0x1e0   : > { %v1209_v55 = vpop.permute.xlu0 %1208 }
 0x1e1   : > { %v1210_v8 = vsel %vm472_vm3, %v1209_v55, %v2876_v27 }
 0x1e2   : > { %599 = vrot.lane.b32.xlu0 %v590_v33, %s2306_s30  ;;  %763 = vrot.lane.b32.xlu1 %v3069_v46, %s2308_s27  ;;  %v1284_v33 = vsub.f32 %v2886_v14, %v1276_v59 }
 0x1e3   : > { %v1206_v19 = vpop.permute.xlu1 %1205 }
 0x1e4   : > { %v1215_v35 = vpop.permute.xlu0 %1214 }
 0x1e6   : > { %603 = vrot.lane.b32.xlu0 %v592_v31, %s2306_s30  ;;  %597 = vrot.lane.b32.xlu1 %v589_v30, %s2306_s30  ;;  %v1046_v30 = vsub.f32 %v2757_v34, %v1036_v52  ;;  %v1216_v31 = vsel %vm472_vm3, %v1215_v35, %v2886_v14  ;;  %v1045_v52 = vsub.f32 %v2763_v43, %v1034_v25 }
 0x1e7   : > { %v1300_v25 = vsub.f32 %v2886_v14, %v1292_v3 }
 0x1e8   : > { %v1524_v49 = vpop.permute.xlu0 %1523 }
 0x1e9   : > { %v1534_v59 = vsub.f32 %v2941_v60, %v1524_v49 }
 0x1ea   : > { %641 = vrot.lane.b32.xlu0 %v633_v57, %s2306_s30  ;;  %601 = vrot.lane.b32.xlu1 %v591_v37, %s2306_s30  ;;  %v1047_v37 = vsub.f32 %v2772_v53, %v1038_v12  ;;  %v1212_v57 = vpop.permute.xlu1 %1211  ;;  %v1298_v12 = vsub.f32 %v2876_v27, %v1288_v5 }
 0x1ee   : > { %645 = vrot.lane.b32.xlu0 %v635_v40, %s2306_s30  ;;  %643 = vrot.lane.b32.xlu1 %v634_v32, %s2306_s30  ;;  %v1297_v32 = vsub.f32 %v2895_v21, %v1286_v1  ;;  %v1528_v40 = vpop.permute.xlu0 %1527  ;;  %v1213_v1 = vsel %vm472_vm3, %v1212_v57, %v2902_v61  ;;  %v3188_v57 = vsel %vm472_vm3, %v3003_v50, %v2763_v43 }
 0x1f2   : > { %835 = vrot.lane.b32.xlu0 %v826_v26, %s2306_s30  ;;  %647 = vrot.lane.b32.xlu1 %v636_v42, %s2306_s30  ;;  %v1522_v42 = vpop.permute.xlu1 %1521  ;;  %v1299_v26 = vsub.f32 %v2902_v61, %v1290_v15 }
 0x1f3   : > { %v1533_v5 = vsub.f32 %v2959_v23, %v1522_v42 }
 0x1f6   : > { %839 = vrot.lane.b32.xlu0 %v828_v2, %s2306_s30  ;;  %833 = vrot.lane.b32.xlu1 %v825_v13, %s2306_s30  ;;  %v1048_v13 = vsub.f32 %v2767_v48, %v1040_v58  ;;  %v1540_v2 = vpop.permute.xlu0 %1539  ;;  %v3577_v58 = vmov 1  }
 0x1fa   : > { %877 = vrot.lane.b32.xlu0 %v869_v56, %s2306_s30  ;;  %837 = vrot.lane.b32.xlu1 %v827_v6, %s2306_s30  ;;  %v1207_v6 = vsel %vm472_vm3, %v1206_v19, %v2895_v21  ;;  %v1526_v56 = vpop.permute.xlu1 %1525  ;;  %v1544_v55 = vpop.permute.xlu0 %1543 }
 0x1fb   : > { %v1552_v3 = vsub.f32 %v2949_v11, %v1544_v55 }
 0x1fe   : > { %881 = vrot.lane.b32.xlu0 %v871_v38, %s2306_s30  ;;  %879 = vrot.lane.b32.xlu1 %v870_v62, %s2306_s30  ;;  %v1538_v62 = vpop.permute.xlu1 %1537  ;;  %v1461_v15 = vpop.permute.xlu0 %1460 }
 0x1ff   : > { %v1549_v38 = vsub.f32 %v2959_v23, %v1538_v62  ;;  %v1462_v35 = vsel %vm472_vm3, %v1461_v15, %v2941_v60 }
 0x202   : > { %1313 = vperm.xlu0 %2065, %v1283_v9   ;;  %883 = vrot.lane.b32.xlu1 %v872_v20, %s2306_s30  ;;  %v1535_v9 = vsub.f32 %v2966_v29, %v1526_v56  ;;  %v1536_v20 = vsub.f32 %v2949_v11, %v1528_v40 }
 0x206   : > { %1318 = vperm.xlu1 %2064, %v1284_v33   ;;  %1219 = vrot.lane.b32.xlu0 %v1210_v8, %s2305_s23  ;;  %v1467_v33 = vpop.permute.xlu0 %1466  ;;  %v1550_v8 = vsub.f32 %v2941_v60, %v1540_v2  ;;  %v3229_v2 = vsel %vm472_vm3, %v3016_v24, %v2767_v48  ;;  %v514_v24 = vadd.f32 %v2790_v63, %v3030_v28 }
 0x207   : > { %v1468_v19 = vsel %vm472_vm3, %v1467_v33, %v2949_v11  ;;  %v749_v63 = vadd.f32 %v2818_v41, %v3046_v44  ;;  %v752_v28 = vadd.f32 %v2821_v45, %v3069_v46 }
 0x20a   : > { %2066 = vset.pattern.permute.xlu1 %v3576_v17  ;;  %1223 = vrot.lane.b32.xlu0 %v1216_v31, %s2305_s23 }
 0x20b   : > { %1100 = vperm.xlu1 %2066, %v1046_v30   ;;  %v1542_v30 = vpop.permute.xlu1 %1541 }
 0x20c   : > { %v1551_v31 = vsub.f32 %v2966_v29, %v1542_v30 }
 0x20e   : > { %1560 = vperm.xlu0 %2065, %v1534_v59  }
 0x20f   : > { %1105 = vperm.xlu1 %2066, %v1047_v37   ;;  %v1458_v49 = vpop.permute.xlu1 %1457 }
 0x210   : > { %v1459_v59 = vsel %vm472_vm3, %v1458_v49, %v2959_v23 }
 0x212   : > { %2068 = vset.pattern.permute.xlu0 %v3576_v17 }
 0x213   : > { %1347 = vperm.xlu1 %2066, %v1297_v32   ;;  %1095 = vperm.xlu0 %2068, %v1045_v52   ;;  %v1464_v37 = vpop.permute.xlu1 %1463  ;;  %v3199_v52 = vsel %vm472_vm3, %v3007_v10, %v2772_v53 }
 0x217   : > { %1357 = vperm.xlu1 %2066, %v1299_v26   ;;  %1110 = vperm.xlu0 %2068, %v1048_v13   ;;  %v3194_v32 = vpop.permute.xlu1 %1051  ;;  %v3222_v26 = vsel %vm472_vm3, %v3014_v22, %v2757_v34  ;;  %v513_v22 = vadd.f32 %v2793_v0, %v3024_v16 }
 0x21b   : > { %1217 = vrot.lane.b32.xlu1 %v1207_v6, %s2305_s23  ;;  %1352 = vperm.xlu0 %2068, %v1298_v12  }
 0x21c   : > { %2067 = vset.pattern.permute.xlu1 %v3577_v58 }
 0x21f   : > { %1221 = vrot.lane.b32.xlu1 %v1213_v1, %s2305_s23  ;;  %1362 = vperm.xlu0 %2068, %v1300_v25  }
 0x223   : > { %1555 = vperm.xlu1 %2067, %v1533_v5   ;;  %1599 = vperm.xlu0 %2068, %v1549_v38   ;;  %v515_v38 = vadd.f32 %v2800_v7, %v3034_v18 }
 0x227   : > { %1565 = vperm.xlu1 %2067, %v1535_v9   ;;  %1614 = vperm.xlu0 %2068, %v1552_v3  }
 0x22b   : > { %1570 = vperm.xlu1 %2067, %v1536_v20   ;;  %1471 = vrot.lane.b32.xlu0 %v1462_v35, %s2305_s23 }
 0x22f   : > { %2069 = vset.pattern.permute.xlu1 %v3576_v17  ;;  %1475 = vrot.lane.b32.xlu0 %v1468_v19, %s2305_s23  ;;  %v1465_v17 = vsel %vm472_vm3, %v1464_v37, %v2966_v29 }
 0x230   : > { %1604 = vperm.xlu1 %2069, %v1550_v8   ;;  %v516_v8 = vadd.f32 %v2797_v4, %v3042_v39  ;;  %v751_v39 = vadd.f32 %v2824_v54, %v3060_v47 }
 0x233   : > { %985 = vrot.lane.b32.xlu0 %v2772_v53, %s2306_s30 }
 0x234   : > { %1609 = vperm.xlu1 %2069, %v1551_v31  }
 0x237   : > { %1233 = vrot.lane.b32.xlu0 %v2895_v21, %s2306_s30 }
 0x238   : > { %1469 = vrot.lane.b32.xlu1 %v1459_v59, %s2305_s23  ;;  %v3203_v40 = vpop.permute.xlu0 %1056 }
 0x23b   : > { %1237 = vrot.lane.b32.xlu0 %v2902_v61, %s2306_s30 }
 0x23c   : > { %1473 = vrot.lane.b32.xlu1 %v1465_v17, %s2305_s23 }
 0x23f   : > { %1001 = vrot.lane.b32.xlu0 %v3188_v57, %s2308_s27 }
 0x240   : > { %983 = vrot.lane.b32.xlu1 %v2757_v34, %s2306_s30 }
 0x243   : > { %1005 = vrot.lane.b32.xlu0 %v3199_v52, %s2308_s27 }
 0x244   : > { %987 = vrot.lane.b32.xlu1 %v2767_v48, %s2306_s30 }
 0x245   : > { %v3207_v43 = vpop.permute.xlu1 %1061 }
 0x248   : > { %1235 = vrot.lane.b32.xlu1 %v2876_v27, %s2306_s30 }
 0x249   : > { %v3211_v50 = vpop.permute.xlu1 %1066  ;;  %v3213_v42 = vpop.permute.xlu0 %1303 }
 0x24c   : > { %1239 = vrot.lane.b32.xlu1 %v2886_v14, %s2306_s30 }
 0x24d   : > { %v3217_v53 = vpop.permute.xlu1 %1308  ;;  %v522_v10 = vpop.permute.xlu0 %521 }
 0x24e   : > { %v533_v55 = vadd.f32 %v522_v10, %v513_v22 }
 0x250   : > { %1003 = vrot.lane.b32.xlu1 %v3222_v26, %s2308_s27 }
 0x251   : > { %v524_v13 = vpop.permute.xlu1 %523  ;;  %v526_v12 = vpop.permute.xlu0 %525 }
 0x252   : > { %v535_v9 = vadd.f32 %v526_v12, %v515_v38  ;;  %v534_v20 = vadd.f32 %v524_v13, %v514_v24 }
 0x254   : > { %1007 = vrot.lane.b32.xlu1 %v3229_v2, %s2308_s27 }
 0x255   : > { %v528_v6 = vpop.permute.xlu1 %527  ;;  %v758_v56 = vpop.permute.xlu0 %757 }
 0x256   : > { %v536_v30 = vadd.f32 %v528_v6, %v516_v8  ;;  %v769_v17 = vadd.f32 %v758_v56, %v749_v63 }
 0x259   : > { %v760_v25 = vpop.permute.xlu1 %759  ;;  %v762_v1 = vpop.permute.xlu0 %761 }
 0x25d   : > { %v764_v58 = vpop.permute.xlu1 %763  ;;  %v600_v34 = vpop.permute.xlu0 %599 }
 0x25e   : > { %v610_v0 = vadd.f32 %v600_v34, %v534_v20  ;;  %v772_v10 = vadd.f32 %v764_v58, %v752_v28  ;;  %v3578_v34 = vld [vmem:[#allocation23_spill] sm:$0xff] }
 0x25f   : > { %v750_v22 = vadd.f32 %v3578_v34, %v3056_v36 }
 0x261   : > { %v598_v62 = vpop.permute.xlu1 %597  ;;  %v604_v5 = vpop.permute.xlu0 %603  ;;  %v770_v44 = vadd.f32 %v760_v25, %v750_v22 }
 0x262   : > { %v609_v48 = vadd.f32 %v598_v62, %v533_v55  ;;  %v612_v7 = vadd.f32 %v604_v5, %v536_v30  ;;  %v771_v55 = vadd.f32 %v762_v1, %v751_v39 }
 0x265   : > { %v602_v3 = vpop.permute.xlu1 %601  ;;  %v642_v15 = vpop.permute.xlu0 %641 }
 0x266   : > { %v611_v35 = vadd.f32 %v602_v3, %v535_v9  ;;  %v653_v33 = vadd.f32 %v642_v15, %v609_v48 }
 0x268   : > { %v657_v62 = vmul.f32 0.11111111, %v653_v33 }
 0x269   : > { %v644_v16 = vpop.permute.xlu1 %643  ;;  %v646_v19 = vpop.permute.xlu0 %645 }
 0x26a   : > { %v654_v31 = vadd.f32 %v644_v16, %v610_v0  ;;  %v655_v49 = vadd.f32 %v646_v19, %v611_v35  ;;  %v1653_v58 = vmul.f32 2.0, %v657_v62  ;;  %v3249_v54 = vmul.f32 %v657_v62, %v657_v62 }
 0x26c   : > { %v658_v46 = vmul.f32 0.11111111, %v654_v31  ;;  %v659_v56 = vmul.f32 0.11111111, %v655_v49 }
 0x26d   : > { %v648_v18 = vpop.permute.xlu1 %647  ;;  %v836_v59 = vpop.permute.xlu0 %835 }
 0x26e   : > { %v656_v37 = vadd.f32 %v648_v18, %v612_v7  ;;  %v846_v48 = vadd.f32 %v836_v59, %v770_v44  ;;  %v1654_v20 = vmul.f32 2.0, %v658_v46  ;;  %v1655_v35 = vmul.f32 2.0, %v659_v56 }
 0x26f   : > { %v3267_v18 = vmul.f32 %v658_v46, %v658_v46  ;;  %v3271_v63 = vmul.f32 %v659_v56, %v659_v56 }
 0x270   : > { %v660_v33 = vmul.f32 0.11111111, %v656_v37 }
 0x271   : > { %v834_v13 = vpop.permute.xlu1 %833  ;;  %v840_v4 = vpop.permute.xlu0 %839 }
 0x272   : > { %v845_v12 = vadd.f32 %v834_v13, %v769_v17  ;;  %v848_v6 = vadd.f32 %v840_v4, %v772_v10  ;;  %v1656_v17 = vmul.f32 2.0, %v660_v33 }
 0x275   : > { %v838_v5 = vpop.permute.xlu1 %837  ;;  %v878_v41 = vpop.permute.xlu0 %877 }
 0x276   : > { %v847_v38 = vadd.f32 %v838_v5, %v771_v55  ;;  %v889_v45 = vadd.f32 %v878_v41, %v845_v12  ;;  %v3293_v55 = vmul.f32 %v660_v33, %v660_v33 }
 0x278   : > { %v893_v24 = vmul.f32 0.11111111, %v889_v45 }
 0x279   : > { %v880_v9 = vpop.permute.xlu1 %879  ;;  %v882_v3 = vpop.permute.xlu0 %881 }
 0x27a   : > { %v3251_v47 = vmul.f32 %v1653_v58, %v893_v24  ;;  %v890_v15 = vadd.f32 %v880_v9, %v846_v48  ;;  %v891_v36 = vadd.f32 %v882_v3, %v847_v38  ;;  %v3253_v1 = vmul.f32 %v893_v24, %v893_v24 }
 0x27b   : > { %v3255_v25 = vmul.f32 %v893_v24, %v657_v62  ;;  %v1072_v58 = vsel %vm420_vm4, %v3211_v50, 0.0 }
 0x27c   : > { %v894_v8 = vmul.f32 0.11111111, %v890_v15  ;;  %v895_v0 = vmul.f32 0.11111111, %v891_v36  ;;  %v3259_v16 = vadd.f32 %v3253_v1, %v3249_v54 }
 0x27d   : > { %v884_v19 = vpop.permute.xlu1 %883  ;;  %v3261_v30 = vpop.permute.xlu0 %1313 }
 0x27e   : > { %v3263_v31 = vmul.f32 %v1654_v20, %v894_v8  ;;  %v3265_v49 = vmul.f32 %v1655_v35, %v895_v0  ;;  %v892_v7 = vadd.f32 %v884_v19, %v848_v6  ;;  %v3269_v59 = vmul.f32 %v894_v8, %v894_v8 }
 0x27f   : > { %v3273_v28 = vmul.f32 %v895_v0, %v895_v0  ;;  %v3275_v37 = vmul.f32 %v894_v8, %v658_v46  ;;  %v3277_v13 = vmul.f32 %v895_v0, %v659_v56  ;;  %v1070_v46 = vsel %vm420_vm4, %v3203_v40, 0.0 }
 0x280   : > { %3579 = vst [vmem:[#allocation23_spill] sm:$0xff] %v3265_v49  ;;  %v896_v10 = vmul.f32 0.11111111, %v892_v7  ;;  %v3281_v12 = vadd.f32 %v3269_v59, %v3267_v18  ;;  %v1069_v8 = vsel %vm420_vm4, %v3194_v32, 0.0  ;;  %v1071_v19 = vsel %vm420_vm4, %v3207_v43, 0.0 }
 0x281   : > { %v1319_v4 = vpop.permute.xlu1 %1318  ;;  %v1220_v39 = vpop.permute.xlu0 %1219  ;;  %v3285_v6 = vadd.f32 %v3273_v28, %v3271_v63  ;;  %v1323_v43 = vsel %vm420_vm4, %v3261_v30, 0.0 }
 0x282   : > { %v3287_v34 = vmul.f32 %v1656_v17, %v896_v10  ;;  %v3291_v22 = vsel %vm472_vm3, %v1220_v39, %v2876_v27  ;;  %v3295_v62 = vmul.f32 %v896_v10, %v896_v10  ;;  %v3299_v5 = vmul.f32 %v896_v10, %v660_v33 }
 0x283   : > { %1255 = vrot.lane.b32.xlu1 %v3291_v22, %s2308_s27  ;;  %v1324_v40 = vsel %vm420_vm4, %v1319_v4, 0.0  ;;  %v1321_v17 = vsel %vm420_vm4, %v3213_v42, 0.0 }
 0x284   : > { %v3303_v41 = vadd.f32 %v3295_v62, %v3293_v55 }
 0x285   : > { %v1224_v44 = vpop.permute.xlu0 %1223 }
 0x286   : > { %v3307_v38 = vsel %vm472_vm3, %v1224_v44, %v2886_v14  ;;  %v1101_v27 = vpop.permute.xlu1 %1100  ;;  %v1322_v14 = vsel %vm420_vm4, %v3217_v53, 0.0 }
 0x287   : > { %1259 = vrot.lane.b32.xlu1 %v3307_v38, %s2308_s27  ;;  %v1114_v53 = vsel %vm421_vm5, %v1101_v27, 0.0 }
 0x289   : > { %v1561_v45 = vpop.permute.xlu0 %1560 }
 0x28a   : > { %v1106_v56 = vpop.permute.xlu1 %1105 }
 0x28b   : > { %1079 = vrot.lane.b32.xlu1 %v1070_v46, %s2306_s30  ;;  %v1115_v30 = vsel %vm421_vm5, %v1106_v56, 0.0  ;;  %v1574_v56 = vsel %vm420_vm4, %v1561_v45, 0.0 }
 0x28e   : > { %v1348_v48 = vpop.permute.xlu1 %1347  ;;  %v1096_v24 = vpop.permute.xlu0 %1095 }
 0x28f   : > { %1083 = vrot.lane.b32.xlu1 %v1072_v58, %s2306_s30  ;;  %v1113_v44 = vsel %vm421_vm5, %v1096_v24, 0.0 }
 0x292   : > { %v1358_v9 = vpop.permute.xlu1 %1357  ;;  %v1111_v3 = vpop.permute.xlu0 %1110 }
 0x293   : > { %1331 = vrot.lane.b32.xlu1 %v1322_v14, %s2306_s30  ;;  %v1367_v14 = vsel %vm421_vm5, %v1358_v9, 0.0 }
 0x296   : > { %v1218_v15 = vpop.permute.xlu1 %1217  ;;  %v1353_v36 = vpop.permute.xlu0 %1352 }
 0x297   : > { %v3327_v50 = vsel %vm472_vm3, %v1218_v15, %v2895_v21  ;;  %1335 = vrot.lane.b32.xlu1 %v1324_v40, %s2306_s30  ;;  %v1116_v21 = vsel %vm421_vm5, %v1111_v3, 0.0 }
 0x298   : > { %1253 = vrot.lane.b32.xlu0 %v3327_v50, %s2308_s27 }
 0x29a   : > { %v1222_v20 = vpop.permute.xlu1 %1221  ;;  %v1363_v33 = vpop.permute.xlu0 %1362 }
 0x29b   : > { %v3336_v35 = vsel %vm472_vm3, %v1222_v20, %v2902_v61  ;;  %1123 = vrot.lane.b32.xlu1 %v1114_v53, %s2306_s30  ;;  %v1366_v61 = vsel %vm421_vm5, %v1353_v36, 0.0  ;;  %v1368_v32 = vsel %vm421_vm5, %v1363_v33, 0.0 }
 0x29c   : > { %1257 = vrot.lane.b32.xlu0 %v3336_v35, %s2308_s27 }
 0x29e   : > { %v1600_v0 = vpop.permute.xlu0 %1599  ;;  %v1556_v7 = vpop.permute.xlu1 %1555 }
 0x29f   : > { %1127 = vrot.lane.b32.xlu1 %v1116_v21, %s2306_s30  ;;  %v1573_v53 = vsel %vm420_vm4, %v1556_v7, 0.0  ;;  %v1617_v33 = vsel %vm421_vm5, %v1600_v0, 0.0 }
 0x2a0   : > { %1077 = vrot.lane.b32.xlu0 %v1069_v8, %s2306_s30 }
 0x2a2   : > { %v1615_v10 = vpop.permute.xlu0 %1614  ;;  %v1566_v4 = vpop.permute.xlu1 %1565 }
 0x2a3   : > { %1375 = vrot.lane.b32.xlu1 %v1366_v61, %s2306_s30  ;;  %v1620_v9 = vsel %vm421_vm5, %v1615_v10, 0.0 }
 0x2a4   : > { %1081 = vrot.lane.b32.xlu0 %v1071_v19, %s2306_s30 }
 0x2a6   : > { %v1472_v39 = vpop.permute.xlu0 %1471  ;;  %v1571_v27 = vpop.permute.xlu1 %1570 }
 0x2a7   : > { %1379 = vrot.lane.b32.xlu1 %v1368_v32, %s2306_s30  ;;  %v3374_v42 = vsel %vm472_vm3, %v1472_v39, %v2941_v60  ;;  %v1576_v3 = vsel %vm420_vm4, %v1571_v27, 0.0 }
 0x2a8   : > { %1329 = vrot.lane.b32.xlu0 %v1321_v17, %s2306_s30 }
 0x2aa   : > { %v1476_v46 = vpop.permute.xlu0 %1475 }
 0x2ab   : > { %1487 = vrot.lane.b32.xlu1 %v2941_v60, %s2306_s30  ;;  %v3383_v58 = vsel %vm472_vm3, %v1476_v46, %v2949_v11  ;;  %v1605_v24 = vpop.permute.xlu1 %1604  ;;  %v1365_v60 = vsel %vm421_vm5, %v1348_v48, 0.0 }
 0x2ac   : > { %1333 = vrot.lane.b32.xlu0 %v1323_v43, %s2306_s30  ;;  %v1618_v48 = vsel %vm421_vm5, %v1605_v24, 0.0 }
 0x2ae   : > { %v986_v7 = vpop.permute.xlu0 %985 }
 0x2af   : > { %1491 = vrot.lane.b32.xlu1 %v2949_v11, %s2306_s30  ;;  %v1610_v11 = vpop.permute.xlu1 %1609 }
 0x2b0   : > { %1121 = vrot.lane.b32.xlu0 %v1113_v44, %s2306_s30  ;;  %v1619_v21 = vsel %vm421_vm5, %v1610_v11, 0.0 }
 0x2b2   : > { %v1234_v17 = vpop.permute.xlu0 %1233 }
 0x2b3   : > { %1507 = vrot.lane.b32.xlu1 %v3374_v42, %s2308_s27  ;;  %v1470_v45 = vpop.permute.xlu1 %1469 }
 0x2b4   : > { %1125 = vrot.lane.b32.xlu0 %v1115_v30, %s2306_s30  ;;  %v3411_v40 = vsel %vm472_vm3, %v1470_v45, %v2959_v23 }
 0x2b6   : > { %v3434_v43 = vpop.permute.xlu0 %1237 }
 0x2b7   : > { %1511 = vrot.lane.b32.xlu1 %v3383_v58, %s2308_s27  ;;  %v1474_v15 = vpop.permute.xlu1 %1473 }
 0x2b8   : > { %1373 = vrot.lane.b32.xlu0 %v1365_v60, %s2306_s30  ;;  %v3418_v36 = vsel %vm472_vm3, %v1474_v15, %v2966_v29 }
 0x2ba   : > { %v1002_v0 = vpop.permute.xlu0 %1001 }
 0x2bb   : > { %1583 = vrot.lane.b32.xlu1 %v1574_v56, %s2306_s30  ;;  %v984_v20 = vpop.permute.xlu1 %983 }
 0x2bc   : > { %1377 = vrot.lane.b32.xlu0 %v1367_v14, %s2306_s30  ;;  %v994_v51 = vadd.f32 %v984_v20, %v3222_v26 }
 0x2be   : > { %v1006_v30 = vpop.permute.xlu0 %1005 }
 0x2bf   : > { %1587 = vrot.lane.b32.xlu1 %v1576_v3, %s2306_s30 }
 0x2c0   : > { %1485 = vrot.lane.b32.xlu0 %v2959_v23, %s2306_s30  ;;  %v1575_v23 = vsel %vm420_vm4, %v1566_v4, 0.0 }
 0x2c3   : > { %1627 = vrot.lane.b32.xlu1 %v1618_v48, %s2306_s30 }
 0x2c4   : > { %1489 = vrot.lane.b32.xlu0 %v2966_v29, %s2306_s30  ;;  %v988_v29 = vpop.permute.xlu1 %987 }
 0x2c5   : > { %v996_v56 = vadd.f32 %v988_v29, %v3229_v2 }
 0x2c7   : > { %1631 = vrot.lane.b32.xlu1 %v1620_v9, %s2306_s30 }
 0x2c8   : > { %1505 = vrot.lane.b32.xlu0 %v3411_v40, %s2308_s27  ;;  %v1236_v8 = vpop.permute.xlu1 %1235 }
 0x2c9   : > { %v1246_v9 = vadd.f32 %v1236_v8, %v3291_v22 }
 0x2cc   : > { %1509 = vrot.lane.b32.xlu0 %v3418_v36, %s2308_s27  ;;  %v1240_v61 = vpop.permute.xlu1 %1239 }
 0x2cd   : > { %v1248_v20 = vadd.f32 %v1240_v61, %v3307_v38  ;;  %v1682_v38 = vadd.f32 0.0001, %v3281_v12  ;;  %v1245_v12 = vadd.f32 %v1234_v17, %v3327_v50 }
 0x2d0   : > { %1581 = vrot.lane.b32.xlu0 %v1573_v53, %s2306_s30  ;;  %v1004_v19 = vpop.permute.xlu1 %1003 }
 0x2d1   : > { %v1014_v24 = vadd.f32 %v1004_v19, %v994_v51 }
 0x2d4   : > { %1585 = vrot.lane.b32.xlu0 %v1575_v23, %s2306_s30  ;;  %v1008_v32 = vpop.permute.xlu1 %1007 }
 0x2d5   : > { %v1016_v3 = vadd.f32 %v1008_v32, %v996_v56 }
 0x2d8   : > { %1625 = vrot.lane.b32.xlu0 %v1617_v33, %s2306_s30 }
 0x2dc   : > { %1629 = vrot.lane.b32.xlu0 %v1619_v21, %s2306_s30 }
 0x2f5   : > { %v1256_v10 = vpop.permute.xlu1 %1255 }
 0x2f6   : > { %v1266_v33 = vadd.f32 %v1256_v10, %v1246_v9 }
 0x2f9   : > { %v1260_v4 = vpop.permute.xlu1 %1259 }
 0x2fa   : > { %v1268_v29 = vadd.f32 %v1260_v4, %v1248_v20 }
 0x2fd   : > { %v1080_v39 = vpop.permute.xlu1 %1079 }
 0x2fe   : > { %v1090_v14 = vadd.f32 %v1080_v39, %v1014_v24 }
 0x301   : > { %v1084_v44 = vpop.permute.xlu1 %1083 }
 0x302   : > { %v1092_v15 = vadd.f32 %v1084_v44, %v1016_v3 }
 0x305   : > { %v1332_v27 = vpop.permute.xlu1 %1331 }
 0x306   : > { %v1342_v19 = vadd.f32 %v1332_v27, %v1266_v33 }
 0x309   : > { %v1336_v46 = vpop.permute.xlu1 %1335 }
 0x30a   : > { %v1254_v60 = vpop.permute.xlu0 %1253  ;;  %v1344_v56 = vadd.f32 %v1336_v46, %v1268_v29  ;;  %v3580_v46 = vld [vmem:[#allocation24_spill] sm:$0xff] }
 0x30b   : > { %v993_v9 = vadd.f32 %v3580_v46, %v3188_v57  ;;  %v1265_v29 = vadd.f32 %v1254_v60, %v1245_v12  ;;  %v1247_v57 = vadd.f32 %v3434_v43, %v3336_v35 }
 0x30d   : > { %v1124_v11 = vpop.permute.xlu1 %1123  ;;  %v1013_v33 = vadd.f32 %v1002_v0, %v993_v9 }
 0x30e   : > { %v1134_v48 = vadd.f32 %v1124_v11, %v1090_v14  ;;  %v1258_v45 = vpop.permute.xlu0 %1257 }
 0x310   : > { %v1138_v53 = vmul.f32 0.11111111, %v1134_v48  ;;  %v995_v48 = vadd.f32 %v986_v7, %v3199_v52 }
 0x311   : > { %v1128_v23 = vpop.permute.xlu1 %1127 }
 0x312   : > { %v1146_v21 = vsub.f32 %v1138_v53, %v3267_v18  ;;  %v1136_v49 = vadd.f32 %v1128_v23, %v1092_v15  ;;  %v1078_v26 = vpop.permute.xlu0 %1077 }
 0x314   : > { %v1140_v51 = vmul.f32 0.11111111, %v1136_v49 }
 0x315   : > { %v1376_v2 = vpop.permute.xlu1 %1375 }
 0x316   : > { %v1148_v32 = vsub.f32 %v1140_v51, %v3293_v55  ;;  %v1386_v39 = vadd.f32 %v1376_v2, %v1342_v19  ;;  %v1082_v24 = vpop.permute.xlu0 %1081  ;;  %v1089_v19 = vadd.f32 %v1078_v26, %v1013_v33 }
 0x318   : > { %v1390_v22 = vmul.f32 0.11111111, %v1386_v39 }
 0x319   : > { %v1380_v8 = vpop.permute.xlu1 %1379 }
 0x31a   : > { %v1398_v44 = vsub.f32 %v1390_v22, %v3269_v59  ;;  %v1388_v10 = vadd.f32 %v1380_v8, %v1344_v56  ;;  %v1330_v14 = vpop.permute.xlu0 %1329  ;;  %v1684_v59 = vadd.f32 0.0001, %v3303_v41  ;;  %v1267_v22 = vadd.f32 %v1258_v45, %v1247_v57 }
 0x31b   : > { %v1341_v7 = vadd.f32 %v1330_v14, %v1265_v29 }
 0x31c   : > { %v1686_v18 = vadd.f32 %v1398_v44, %v1146_v21  ;;  %v1392_v11 = vmul.f32 0.11111111, %v1388_v10  ;;  %v1015_v21 = vadd.f32 %v1006_v30, %v995_v48 }
 0x31d   : > { %v1488_v3 = vpop.permute.xlu1 %1487 }
 0x31e   : > { %v1690_v61 = vadd.f32 0.0009, %v1686_v18  ;;  %v1400_v49 = vsub.f32 %v1392_v11, %v3295_v62  ;;  %v1334_v4 = vpop.permute.xlu0 %1333  ;;  %v1091_v62 = vadd.f32 %v1082_v24, %v1015_v21  ;;  %v1498_v35 = vadd.f32 %v1488_v3, %v3374_v42 }
 0x31f   : > { %v1343_v50 = vadd.f32 %v1334_v4, %v1267_v22  ;;  %v1683_v3 = vadd.f32 0.0001, %v3285_v6  ;;  %v1662_v21 = vadd.f32 0.0001, %v3263_v31 }
 0x320   : > { %v1694_v27 = vmul.f32 %v1690_v61, %v1682_v38  ;;  %v1688_v55 = vadd.f32 %v1400_v49, %v1148_v32  ;;  %v1681_v38 = vadd.f32 0.0001, %v3259_v16 }
 0x321   : > { %v1492_v15 = vpop.permute.xlu1 %1491 }
 0x322   : > { %v1692_v53 = vadd.f32 0.0009, %v1688_v55  ;;  %v1122_v23 = vpop.permute.xlu0 %1121  ;;  %2070 = vrcp.f32 %v1694_v27  ;;  %v1500_v49 = vadd.f32 %v1492_v15, %v3383_v58 }
 0x323   : > { %v1133_v32 = vadd.f32 %v1122_v23, %v1089_v19 }
 0x324   : > { %v1696_v20 = vmul.f32 %v1692_v53, %v1684_v59 }
 0x325   : > { %v1508_v51 = vpop.permute.xlu1 %1507  ;;  %v1137_v0 = vmul.f32 0.11111111, %v1133_v32 }
 0x326   : > { %v1126_v2 = vpop.permute.xlu0 %1125  ;;  %v1518_v11 = vadd.f32 %v1508_v51, %v1498_v35  ;;  %2072 = vrcp.f32 %v1696_v20  ;;  %v1664_v20 = vadd.f32 0.0001, %v3287_v34 }
 0x327   : > { %v1135_v52 = vadd.f32 %v1126_v2, %v1091_v62  ;;  %v1145_v60 = vsub.f32 %v1137_v0, %v3249_v54 }
 0x329   : > { %v1139_v39 = vmul.f32 0.11111111, %v1135_v52  ;;  %v1512_v41 = vpop.permute.xlu1 %1511 }
 0x32a   : > { %v1374_v56 = vpop.permute.xlu0 %1373  ;;  %v1520_v48 = vadd.f32 %v1512_v41, %v1500_v49 }
 0x32b   : > { %v1147_v30 = vsub.f32 %v1139_v39, %v3271_v63  ;;  %v1385_v8 = vadd.f32 %v1374_v56, %v1341_v7 }
 0x32d   : > { %v1389_v17 = vmul.f32 0.11111111, %v1385_v8  ;;  %v1584_v26 = vpop.permute.xlu1 %1583 }
 0x32e   : > { %v1378_v24 = vpop.permute.xlu0 %1377  ;;  %v1594_v4 = vadd.f32 %v1584_v26, %v1518_v11  ;;  %v1661_v11 = vadd.f32 0.0001, %v3251_v47 }
 0x32f   : > { %v1397_v44 = vsub.f32 %v1389_v17, %v3253_v1  ;;  %v1387_v10 = vadd.f32 %v1378_v24, %v1343_v50  ;;  %v2071_v2 = vpop.eup %2070 }
 0x331   : > { %v1685_v43 = vadd.f32 %v1397_v44, %v1145_v60  ;;  %v1391_v14 = vmul.f32 0.11111111, %v1387_v10  ;;  %v1588_v18 = vpop.permute.xlu1 %1587 }
 0x332   : > { %v1486_v45 = vpop.permute.xlu0 %1485  ;;  %v1596_v59 = vadd.f32 %v1588_v18, %v1520_v48 }
 0x333   : > { %v1689_v63 = vadd.f32 0.0009, %v1685_v43  ;;  %v1399_v61 = vsub.f32 %v1391_v14, %v3273_v28  ;;  %v2073_v7 = vpop.eup %2072  ;;  %v1497_v39 = vadd.f32 %v1486_v45, %v3411_v40 }
 0x335   : > { %v1693_v54 = vmul.f32 %v1689_v63, %v1681_v38  ;;  %v1687_v55 = vadd.f32 %v1399_v61, %v1147_v30  ;;  %v1628_v1 = vpop.permute.xlu1 %1627 }
 0x336   : > { %v1638_v46 = vadd.f32 %v1628_v1, %v1594_v4  ;;  %v1490_v42 = vpop.permute.xlu0 %1489  ;;  %v3581_v4 = vld [vmem:[#allocation23_spill] sm:$0xff] }
 0x337   : > { %v1691_v9 = vadd.f32 0.0009, %v1687_v55  ;;  %2074 = vrcp.f32 %v1693_v54  ;;  %v1499_v30 = vadd.f32 %v1490_v42, %v3418_v36  ;;  %v1663_v54 = vadd.f32 0.0001, %v3581_v4 }
 0x338   : > { %v1642_v53 = vmul.f32 0.11111111, %v1638_v46 }
 0x339   : > { %v1695_v16 = vmul.f32 %v1691_v9, %v1683_v3  ;;  %v1632_v23 = vpop.permute.xlu1 %1631 }
 0x33a   : > { %v1650_v28 = vsub.f32 %v1642_v53, %v3275_v37  ;;  %v1640_v27 = vadd.f32 %v1632_v23, %v1596_v59  ;;  %v1506_v33 = vpop.permute.xlu0 %1505 }
 0x33b   : > { %v1517_v22 = vadd.f32 %v1506_v33, %v1497_v39  ;;  %2076 = vrcp.f32 %v1695_v16 }
 0x33c   : > { %v1666_v58 = vmul.f32 2.0, %v1650_v28  ;;  %v1644_v15 = vmul.f32 0.11111111, %v1640_v27 }
 0x33e   : > { %v1670_v12 = vadd.f32 0.0009, %v1666_v58  ;;  %v1652_v19 = vsub.f32 %v1644_v15, %v3299_v5  ;;  %v1510_v62 = vpop.permute.xlu0 %1509 }
 0x33f   : > { %v1519_v26 = vadd.f32 %v1510_v62, %v1499_v30 }
 0x340   : > { %v1674_v51 = vmul.f32 %v1670_v12, %v1662_v21  ;;  %v1668_v6 = vmul.f32 2.0, %v1652_v19 }
 0x342   : > { %v1700_v29 = vmul.f32 %v2071_v2, %v1674_v51  ;;  %v1672_v32 = vadd.f32 0.0009, %v1668_v6  ;;  %v1582_v52 = vpop.permute.xlu0 %1581 }
 0x343   : > { %v1593_v8 = vadd.f32 %v1582_v52, %v1517_v22 }
 0x344   : > { %v1706_v57 = vsub.f32 1.0, %v1700_v29  ;;  %v1676_v37 = vmul.f32 %v1672_v32, %v1664_v20  ;;  %v2075_v49 = vpop.eup %2074 }
 0x346   : > { %v1704_v41 = vmul.f32 %v2073_v7, %v1676_v37  ;;  %v1586_v56 = vpop.permute.xlu0 %1585  ;;  %v1710_v31 = vmul.f32 0.5, %v1706_v57 }
 0x347   : > { %v1595_v40 = vadd.f32 %v1586_v56, %v1519_v26 }
 0x348   : > { %v1708_v0 = vsub.f32 1.0, %v1704_v41  ;;  %v1714_v5 = vmax.f32 %v1710_v31, 0.0  ;;  %v2077_v46 = vpop.eup %2076 }
 0x34a   : > { %v1626_v50 = vpop.permute.xlu0 %1625  ;;  %v1718_v34 = vmin.f32 %v1714_v5, 1.0  ;;  %v1712_v17 = vmul.f32 0.5, %v1708_v0 }
 0x34b   : > { %v1637_v24 = vadd.f32 %v1626_v50, %v1593_v8 }
 0x34c   : > { %1727 = vrot.lane.b32.xlu1 %v1718_v34, %s2311_s6  ;;  %v1716_v60 = vmax.f32 %v1712_v17, 0.0 }
 0x34d   : > { %v1641_v44 = vmul.f32 0.11111111, %v1637_v24 }
 0x34e   : > { %v1630_v10 = vpop.permute.xlu0 %1629  ;;  %v1720_v35 = vmin.f32 %v1716_v60, 1.0 }
 0x34f   : > { %v1649_v43 = vsub.f32 %v1641_v44, %v3255_v25  ;;  %v1639_v14 = vadd.f32 %v1630_v10, %v1595_v40 }
 0x350   : > { %1731 = vrot.lane.b32.xlu1 %v1720_v35, %s2311_s6 }
 0x351   : > { %v1665_v36 = vmul.f32 2.0, %v1649_v43  ;;  %v1643_v18 = vmul.f32 0.11111111, %v1639_v14 }
 0x353   : > { %v1669_v45 = vadd.f32 0.0009, %v1665_v36  ;;  %v1651_v38 = vsub.f32 %v1643_v18, %v3277_v13 }
 0x355   : > { %v1673_v63 = vmul.f32 %v1669_v45, %v1661_v11  ;;  %v1667_v61 = vmul.f32 2.0, %v1651_v38 }
 0x357   : > { %v1698_v55 = vmul.f32 %v2075_v49, %v1673_v63  ;;  %v1671_v1 = vadd.f32 0.0009, %v1667_v61 }
 0x359   : > { %v1705_v48 = vsub.f32 1.0, %v1698_v55  ;;  %v1675_v25 = vmul.f32 %v1671_v1, %v1663_v54 }
 0x35b   : > { %v1702_v42 = vmul.f32 %v2077_v46, %v1675_v25  ;;  %v1709_v3 = vmul.f32 0.5, %v1705_v48 }
 0x35d   : > { %v1707_v9 = vsub.f32 1.0, %v1702_v42  ;;  %v1713_v47 = vmax.f32 %v1709_v3, 0.0 }
 0x35f   : > { %v1717_v59 = vmin.f32 %v1713_v47, 1.0  ;;  %v1711_v53 = vmul.f32 0.5, %v1707_v9 }
 0x361   : > { %1725 = vrot.lane.b32.xlu0 %v1717_v59, %s2311_s6  ;;  %v1715_v13 = vmax.f32 %v1711_v53, 0.0 }
 0x363   : > { %v1719_v16 = vmin.f32 %v1715_v13, 1.0 }
 0x365   : > { %1729 = vrot.lane.b32.xlu0 %v1719_v16, %s2311_s6 }
 0x3be   : > { %v1728_v23 = vpop.permute.xlu1 %1727 }
 0x3bf   : > { %1739 = vst.msk [vmem:[%s360_s22 + $0x8] sm:$0xff] %vm1737_vm6, %v1728_v23 }
 0x3c2   : > { %v1732_v28 = vpop.permute.xlu1 %1731 }
 0x3c3   : > { %1741 = vst.msk [vmem:[%s360_s22 + $0x18] sm:$0xff] %vm1737_vm6, %v1732_v28 }
 0x3d3   : > { %v1726_v27 = vpop.permute.xlu0 %1725 }
 0x3d4   : > { %1738 = vst.msk [vmem:[%s360_s22] sm:$0xff] %vm1737_vm6, %v1726_v27 }
 0x3d7   : > { %v1730_v33 = vpop.permute.xlu0 %1729 }
 0x3d8   : > { %1740 = vst.msk [vmem:[%s360_s22 + $0x10] sm:$0xff] %vm1737_vm6, %v1730_v33 }
 0x3d9   : > { %2203 = shalt.err (!%p2200_p13)
}
 0x3da   : > { %s2204_s12 = scalar_lea.hbm %s3482_s10, 512  ;;  %s2208_s8 = scalar_lea.hbm %s3583_s29, 2048 }
 0x3db   : > { %p2205_p4 = scmp.ne.s32.totalorder %s3482_s10, %s2204_s12  ;;  %p2209_p6 = scmp.lt.s32.totalorder %s3482_s10, %s3583_s29 }
 0x3dc   : > { %p2210_p7 = scmp.lt.s32.totalorder %s2208_s8, %s2204_s12 }
 0x3dd   : > { %p2206_p5 = pnand %p2205_p4, %p2410_p9 }
 0x3de   : > { %p2211_p8 = por %p2210_p7, %p2209_p6 }
 0x3df   : > { %p2207_p1 = pneg %p2206_p5 }
 0x3e1   : > { %p2212_p0 = pnand %p2211_p8, %p2207_p1 }
 0x3e3   : > { %2215 = shalt.err (!%p2212_p0)
}
 0x3e4   : > { %s2313_s30 = smov 128   ;;  %s2314_s28 = smov 256  }
 0x3e5   : > { %s2315_s27 = smov 8  }
 0x3e6   : > { %1956 = dma.vmem_to_hbm [thread:$0]  (%p2410_p9), %s3477_s24, 512, %s3482_s10, %s1743_s9, %s2313_s30, %s2314_s28, %s2315_s27  }
 0x3e7 PF: > { %s3584_s6 = sld [smem:[#allocation17_spill]] }
 0x3e8   : > { %s3585_s22 = sld [smem:[#allocation15_spill]] }
 0x3ed   : > { %p1976_p2 = scmp.ge.s32.totalorder %s3584_s6, 2 }
 0x3ee   : > { %s1772_s0 = sand.u32 1, %s3585_s22  }
 0x3ef   : > { %p1972_p3 = pnand %p1976_p2, %p2416_p12  ;;  %s1773_s25 = scalar_lea.sflag [#allocation4], %s1772_s0 }
 0x3f1   : > { %p1973_p10 = pneg %p1972_p3 }
 0x3f3   : > { %2261 = dma.done.wait (%p1973_p10), %s1773_s25, 512  }
 0x3f4   : > { %2263 = vsyncadd (%p1973_p10), %s1773_s25, 4294966784  ;;  %s26_s22 = sadd.s32 1, %s3584_s6   ;;  %s3587_s5 = sld [smem:[#allocation16_spill]] }
 0x3f5   : > { %p23_p11 = scmp.ge.s32.totalorder %s26_s22, 6   ;;  %s3588_s17 = sld [smem:[#allocation22_spill]] }
 0x3f6   : > { %s3589_s1 = sld [smem:[#allocation18_spill]]  ;;  %s3591_s15 = smov %s2270_s16 }
 0x3f7   : > { %s3590_s24 = sld [smem:[#allocation19_spill]]  ;;  %s3593_s18 = smov %s2286_s20 }
 0x3f8   : > { %s3594_s19 = smov %s2290_s21 }
 0x3f9   :  { %25 = sbr.rel (!%p23_p11) target bundleno = 15 (0xf), region = 118 }
 0x3fa   : > { %s3592_s16 = smov %s3587_s5 }
 0x3fc   : > { %s3595_s20 = smov %s3589_s1 }
 0x3fd   : > { %s3596_s21 = smov %s3590_s24 }
 0x3fe   :  { %1778 = vsyncpa [#allocation3], 1 }
 0x3ff   :  { %1780 = vsyncpa [#allocation3 + $0x1], 1 }
 0x400   :  { %1781 = vsyncpa [#allocation6], 1 }
 0x401   :  { %1783 = vsyncpa [#allocation6 + $0x1], 1 }
 0x402   :  { %1784 = vsyncpa [#allocation9], 1 }
 0x403   :  { %1786 = vsyncpa [#allocation9 + $0x1], 1 }
 0x404   :  { %1787 = vsyncpa [#allocation4], 1 }
 0x405   :  { %1789 = vsyncpa [#allocation4 + $0x1], 1 }

</bundles_post_ra>
